<compile_context>
chip_gen: v7x
topology: tpu7x:2x2x1
jax: 0.10.0
libtpu: 0.0.40
codegen_flags: <defaults>
</compile_context>

<pallas_src>
import functools

import jax
import jax.numpy as jnp
import numpy as np
from jax import lax
from jax.experimental import pallas as pl
from jax.experimental.pallas import tpu as pltpu

_LN_EPS = 1e-5
_VMEM_LIMIT = 32 * 1024 * 1024  # raise this (v6e) / query-tile att (v7x) for large N


# --------------------------------------------------------------------------
# Kernel A: attention block = to_qkv + attention + to_out + residual + LayerNorm
# --------------------------------------------------------------------------

def _attn_block_kernel(mask_ref,                      # scalar prefetch (SMEM), (H,) int32
                       x_ref, att_ref, wqkv_ref, wout_ref, bout_ref, g_ref, be_ref,
                       o_ref,
                       qkv_scr, acc_ref,
                       *, scale, alpha, heads, dim_head, inner):
    x = x_ref[0]                                                     # (N, dim) f32

    # fused QKV projection (bf16 operands, f32 accumulation), kept in VMEM scratch
    qkv_scr[...] = lax.dot_general(
        x.astype(jnp.bfloat16), wqkv_ref[...].astype(jnp.bfloat16),
        (((1,), (0,)), ((), ())), preferred_element_type=jnp.float32)  # (N, 3*inner)

    # accumulator for  sum_h (attn_h @ v_h) @ W_out[h*D:(h+1)*D]  -> (N, dim)
    acc_ref[...] = jnp.zeros_like(acc_ref)

    def _softmax(z):
        m = jnp.max(z, axis=-1, keepdims=True)
        e = jnp.exp(z - m)
        return e * pl.reciprocal(jnp.sum(e, axis=-1, keepdims=True), approx=True)

    D = dim_head
    for h in range(heads):                       # static unroll; one grid step per batch
        @pl.when(mask_ref[h] > 0)                # skip dropped heads entirely
        def _(h=h):
            q = qkv_scr[:, h * D:(h + 1) * D]                              # (N, D)
            k = qkv_scr[:, inner + h * D: inner + (h + 1) * D]             # (N, D)
            v = qkv_scr[:, 2 * inner + h * D: 2 * inner + (h + 1) * D]     # (N, D)

            dots = lax.dot_general(
                q.astype(jnp.bfloat16), k.astype(jnp.bfloat16),
                (((1,), (1,)), ((), ())),                   # contract D, no transpose
                preferred_element_type=jnp.float32) * scale                # (N, N)

            blend = alpha * _softmax(dots) + (1.0 - alpha) * _softmax(att_ref[0, h])

            out_h = lax.dot_general(
                blend.astype(jnp.bfloat16), v.astype(jnp.bfloat16),
                (((1,), (0,)), ((), ())),
                preferred_element_type=jnp.float32)                        # (N, D)

            wo_h = wout_ref[h * D:(h + 1) * D, :].astype(jnp.bfloat16)     # (D, dim)
            acc_ref[...] += lax.dot_general(
                out_h.astype(jnp.bfloat16), wo_h,
                (((1,), (0,)), ((), ())),
                preferred_element_type=jnp.float32)                        # (N, dim)

    # to_out bias + residual + shared post-norm LayerNorm
    z = acc_ref[...] + bout_ref[...] + x
    mu = jnp.mean(z, axis=-1, keepdims=True)
    var = jnp.mean((z - mu) * (z - mu), axis=-1, keepdims=True)
    zn = (z - mu) * lax.rsqrt(var + _LN_EPS)
    o_ref[0] = (zn * g_ref[...] + be_ref[...]).astype(o_ref.dtype)


def attn_block(x, att, head_mask, *, w_qkv, w_out, b_out, gamma, beta,
               scale, alpha, heads, dim_head):
    """x: (B,N,dim); att: (B,H,N,N); head_mask: (H,) int32 (1=keep, 0=drop)."""
    B, N, dim = x.shape
    H, D = heads, dim_head
    inner = H * D

    kernel = functools.partial(
        _attn_block_kernel, scale=float(scale), alpha=float(alpha),
        heads=H, dim_head=D, inner=inner)

    return pl.pallas_call(
        kernel,
        out_shape=jax.ShapeDtypeStruct((B, N, dim), jnp.float32),
        grid_spec=pltpu.PrefetchScalarGridSpec(
            num_scalar_prefetch=1,
            grid=(B,),
            in_specs=[
                pl.BlockSpec((1, N, dim), lambda b, m: (b, 0, 0)),       # x (residual)
                pl.BlockSpec((1, H, N, N), lambda b, m: (b, 0, 0, 0)),   # att logits
                pl.BlockSpec((dim, 3 * inner), lambda b, m: (0, 0)),     # W_qkv (resident)
                pl.BlockSpec((inner, dim), lambda b, m: (0, 0)),         # W_out (resident)
                pl.BlockSpec((1, dim), lambda b, m: (0, 0)),             # b_out
                pl.BlockSpec((1, dim), lambda b, m: (0, 0)),             # LN gamma
                pl.BlockSpec((1, dim), lambda b, m: (0, 0)),             # LN beta
            ],
            out_specs=pl.BlockSpec((1, N, dim), lambda b, m: (b, 0, 0)),
            scratch_shapes=[
                pltpu.VMEM((N, 3 * inner), jnp.float32),   # fused QKV
                pltpu.VMEM((N, dim), jnp.float32),         # head accumulator
            ],
        ),
        compiler_params=pltpu.CompilerParams(
            dimension_semantics=("parallel",),
            vmem_limit_bytes=_VMEM_LIMIT),
    )(head_mask, x, att, w_qkv, w_out,
      b_out.reshape(1, -1), gamma.reshape(1, -1), beta.reshape(1, -1))


# --------------------------------------------------------------------------
# Kernel B: FeedForward block = Linear + GELU + Linear + residual + LayerNorm
# --------------------------------------------------------------------------

def _ffn_block_kernel(x_ref, w1_ref, b1_ref, w2_ref, b2_ref, g_ref, be_ref, o_ref):
    x = x_ref[...]                                                    # (tm, dim) f32
    h = lax.dot_general(
        x.astype(jnp.bfloat16), w1_ref[...].astype(jnp.bfloat16),
        (((1,), (0,)), ((), ())), preferred_element_type=jnp.float32) + b1_ref[...]
    h = jax.nn.gelu(h, approximate=True)                              # f32 VPU/EUP math
    y = lax.dot_general(
        h.astype(jnp.bfloat16), w2_ref[...].astype(jnp.bfloat16),
        (((1,), (0,)), ((), ())), preferred_element_type=jnp.float32) + b2_ref[...]
    z = y + x                                                         # residual
    mu = jnp.mean(z, axis=-1, keepdims=True)
    var = jnp.mean((z - mu) * (z - mu), axis=-1, keepdims=True)
    zn = (z - mu) * lax.rsqrt(var + _LN_EPS)
    o_ref[...] = (zn * g_ref[...] + be_ref[...]).astype(o_ref.dtype)


def _pick_row_tile(m):
    for t in (256, 128, 64, 32, 16, 8):
        if m % t == 0 and (m // t) >= 2:
            return t
    for t in (256, 128, 64, 32, 16, 8):
        if m % t == 0:
            return t
    return m


def ffn_block(x2d, w1, b1, w2, b2, gamma, beta, *, block_rows=None):
    """x2d: (M, dim). Tiled over rows; weights stay VMEM-resident across steps."""
    M, dim = x2d.shape
    hidden = w1.shape[1]
    tm = block_rows if block_rows is not None else _pick_row_tile(M)
    assert M % tm == 0

    return pl.pallas_call(
        _ffn_block_kernel,
        out_shape=jax.ShapeDtypeStruct((M, dim), jnp.float32),
        grid=(M // tm,),
        in_specs=[
            pl.BlockSpec((tm, dim), lambda i: (i, 0)),
            pl.BlockSpec((dim, hidden), lambda i: (0, 0)),
            pl.BlockSpec((1, hidden), lambda i: (0, 0)),
            pl.BlockSpec((hidden, dim), lambda i: (0, 0)),
            pl.BlockSpec((1, dim), lambda i: (0, 0)),
            pl.BlockSpec((1, dim), lambda i: (0, 0)),
            pl.BlockSpec((1, dim), lambda i: (0, 0)),
        ],
        out_specs=pl.BlockSpec((tm, dim), lambda i: (i, 0)),
        compiler_params=pltpu.CompilerParams(
            dimension_semantics=("parallel",),
            vmem_limit_bytes=_VMEM_LIMIT),
    )(x2d, w1, b1.reshape(1, -1), w2, b2.reshape(1, -1),
      gamma.reshape(1, -1), beta.reshape(1, -1))


# --------------------------------------------------------------------------
# Module
# --------------------------------------------------------------------------

class TransformerPostnormAttPallas:
    def __init__(self, dim, depth, heads, dim_head, mlp_dim, dropout=0.0, *, key):
        inner = heads * dim_head
        self.dim, self.depth = dim, depth
        self.heads, self.dim_head, self.inner, self.mlp_dim = heads, dim_head, inner, mlp_dim
        self.scale = dim_head ** (-0.5)
        self.project_out = not (heads == 1 and dim_head == dim)
        # dropout == 0.0 -> identity (eval semantics)

        def uniform(k, shape, fan_in):
            b = 1.0 / np.sqrt(fan_in)
            return jax.random.uniform(k, shape, jnp.float32, -b, b)

        self.layers = []
        for lk in jax.random.split(key, depth):
            k1, k2, k3, k4, k5, k6, k7 = jax.random.split(lk, 7)
            lp = {
                # weights stored pre-transposed to (in_features, out_features)
                "w_qkv": uniform(k1, (dim, 3 * inner), dim),
                "w1": uniform(k4, (dim, mlp_dim), dim),
                "b1": uniform(k5, (mlp_dim,), dim),
                "w2": uniform(k6, (mlp_dim, dim), mlp_dim),
                "b2": uniform(k7, (dim,), mlp_dim),
            }
            if self.project_out:
                lp["w_out"] = uniform(k2, (inner, dim), inner)
                lp["b_out"] = uniform(k3, (dim,), inner)
            else:  # to_out == nn.Identity() (only possible when inner == dim)
                lp["w_out"] = jnp.eye(inner, dtype=jnp.float32)
                lp["b_out"] = jnp.zeros((dim,), jnp.float32)
            self.layers.append(lp)

        # shared post-norm LayerNorm (PyTorch init: weight=1, bias=0)
        self.gamma = jnp.ones((dim,), jnp.float32)
        self.beta = jnp.zeros((dim,), jnp.float32)

    def __call__(self, x, att, head_masks, alpha):
        """x: (B,N,dim); att: (B,H,N,N); head_masks: (depth,H) int32 (1=keep, 0=drop)."""
        B, N, dim = x.shape
        for i, lp in enumerate(self.layers):
            # x = norm(attn(x, att, p, alpha) + x)   -- fully fused in kernel A
            x = attn_block(
                x, att, head_masks[i],
                w_qkv=lp["w_qkv"], w_out=lp["w_out"], b_out=lp["b_out"],
                gamma=self.gamma, beta=self.beta,
                scale=self.scale, alpha=alpha,
                heads=self.heads, dim_head=self.dim_head)
            # x = norm(ff(x) + x)                    -- fully fused in kernel B
            x = ffn_block(
                x.reshape(B * N, dim),
                lp["w1"], lp["b1"], lp["w2"], lp["b2"],
                self.gamma, self.beta).reshape(B, N, dim)
        return x


def draw_head_masks(key, p, depth, heads):
    # torch: a = np.random.binomial(1, p, size=heads); a[i]==1 -> zero head i (per layer)
    dropped = jax.random.bernoulli(key, p, (depth, heads))
    return 1 - dropped.astype(jnp.int32)   # 1 = keep, 0 = drop


# --------------------------------------------------------------------------
# Pure-JAX float32 reference (mirrors the PyTorch forward)
# --------------------------------------------------------------------------

def reference_forward(model, x, att, head_masks, alpha):
    H, D = model.heads, model.dim_head
    B, N, dim = x.shape
    inner = H * D

    def layernorm(z):
        mu = jnp.mean(z, axis=-1, keepdims=True)
        var = jnp.mean((z - mu) ** 2, axis=-1, keepdims=True)
        return (z - mu) / jnp.sqrt(var + _LN_EPS) * model.gamma + model.beta

    for i, lp in enumerate(model.layers):
        mask = head_masks[i].astype(jnp.float32)
        qkv = x @ lp["w_qkv"]
        q, k, v = jnp.split(qkv, 3, axis=-1)
        split = lambda t: jnp.transpose(t.reshape(B, N, H, D), (0, 2, 1, 3))
        q, k, v = split(q), split(k), split(v)
        dots = jnp.einsum("bhqd,bhkd->bhqk", q, k) * model.scale
        attn = alpha * jax.nn.softmax(dots, axis=-1) + (1.0 - alpha) * jax.nn.softmax(att, axis=-1)
        attn = attn * mask[None, :, None, None]
        out = jnp.einsum("bhqk,bhkd->bhqd", attn, v)
        out = jnp.transpose(out, (0, 2, 1, 3)).reshape(B, N, inner)
        out = out @ lp["w_out"] + lp["b_out"]
        x = layernorm(out + x)
        hdn = jax.nn.gelu(x @ lp["w1"] + lp["b1"], approximate=True)
        y = hdn @ lp["w2"] + lp["b2"]
        x = layernorm(y + x)
    return x


# --------------------------------------------------------------------------
# Main
# --------------------------------------------------------------------------

if __name__ == "__main__":
    key = jax.random.PRNGKey(0)
    k_param, k_x, k_att, k_mask = jax.random.split(key, 4)

    B, N, DIM = 2, 8, 32
    DEPTH, HEADS, DIM_HEAD, MLP_DIM = 2, 4, 16, 64
    p, alpha = 0.5, 0.7

    model = TransformerPostnormAttPallas(DIM, DEPTH, HEADS, DIM_HEAD, MLP_DIM, key=k_param)

    x = jax.random.normal(k_x, (B, N, DIM), jnp.float32)
    att = jax.random.normal(k_att, (B, HEADS, N, N), jnp.float32)
    head_masks = draw_head_masks(k_mask, p, DEPTH, HEADS)

    out = model(x, att, head_masks, alpha)
    out = jax.block_until_ready(out)

    ref = reference_forward(model, x, att, head_masks, alpha)
    # bf16 MXU operands (f32 accumulation) + approx reciprocal over 2 layers -> relaxed tol.
    np.testing.assert_allclose(np.asarray(out), np.asarray(ref), rtol=5e-2, atol=5e-2)

    print("KERNEL_OK")
</pallas_src>

<mosaic_0001>
module attributes {stable_mosaic.version = 11 : i64} {
  func.func @_attn_block_kernel(%arg0: i32, %arg1: memref<4xi32, #tpu.memory_space<smem>>, %arg2: memref<1x8x32xf32, #tpu.memory_space<vmem>>, %arg3: memref<1x4x8x8xf32, #tpu.memory_space<vmem>>, %arg4: memref<32x192xf32, #tpu.memory_space<vmem>>, %arg5: memref<64x32xf32, #tpu.memory_space<vmem>>, %arg6: memref<1x32xf32, #tpu.memory_space<vmem>>, %arg7: memref<1x32xf32, #tpu.memory_space<vmem>>, %arg8: memref<1x32xf32, #tpu.memory_space<vmem>>, %arg9: memref<1x8x32xf32, #tpu.memory_space<vmem>>, %arg10: memref<8x192xf32, #tpu.memory_space<vmem>>, %arg11: memref<8x32xf32, #tpu.memory_space<vmem>>) attributes {dimension_semantics = [#tpu.dimension_semantics<parallel>], iteration_bounds = array<i64: 2>, scalar_prefetch = 1 : i64, scratch_operands = 2 : i64, tpu.core_type = #tpu.core_type<tc>, window_params = [{transform_indices = @transform_0, window_bounds = array<i64: 1, 8, 32>}, {transform_indices = @transform_1, window_bounds = array<i64: 1, 4, 8, 8>}, {pipeline_mode = #tpu.pipeline_mode<synchronous>, transform_indices = @transform_2, window_bounds = array<i64: 32, 192>}, {pipeline_mode = #tpu.pipeline_mode<synchronous>, transform_indices = @transform_3, window_bounds = array<i64: 64, 32>}, {pipeline_mode = #tpu.pipeline_mode<synchronous>, transform_indices = @transform_4, window_bounds = array<i64: 1, 32>}, {pipeline_mode = #tpu.pipeline_mode<synchronous>, transform_indices = @transform_5, window_bounds = array<i64: 1, 32>}, {pipeline_mode = #tpu.pipeline_mode<synchronous>, transform_indices = @transform_6, window_bounds = array<i64: 1, 32>}, {transform_indices = @transform_7, window_bounds = array<i64: 1, 8, 32>}]} {
    %c0 = arith.constant 0 : index
    %c0_0 = arith.constant 0 : index
    %c0_1 = arith.constant 0 : index
    %0 = vector.load %arg2[%c0, %c0_0, %c0_1] : memref<1x8x32xf32, #tpu.memory_space<vmem>>, vector<1x8x32xf32>
    %1 = vector.shape_cast %0 : vector<1x8x32xf32> to vector<8x32xf32>
    %2 = arith.truncf %1 : vector<8x32xf32> to vector<8x32xbf16>
    %c0_2 = arith.constant 0 : index
    %c0_3 = arith.constant 0 : index
    %3 = vector.load %arg4[%c0_2, %c0_3] : memref<32x192xf32, #tpu.memory_space<vmem>>, vector<32x192xf32>
    %4 = arith.truncf %3 : vector<32x192xf32> to vector<32x192xbf16>
    %cst = arith.constant dense<0.000000e+00> : vector<8x192xf32>
    %5 = tpu.matmul %2, %4, %cst {dimension_numbers = #tpu.dot_dimension_numbers<[1], [0], [0], [1], [0, 0, 1, 1], [], []>} : vector<8x32xbf16>, vector<32x192xbf16>, vector<8x192xf32> -> vector<8x192xf32>
    %c0_4 = arith.constant 0 : index
    %c0_5 = arith.constant 0 : index
    %6 = vector.load %arg10[%c0_4, %c0_5] : memref<8x192xf32, #tpu.memory_space<vmem>>, vector<8x192xf32>
    tpu.vector_store %arg10[%c0_4, %c0_5], %5 {strides = array<i32>} : memref<8x192xf32, #tpu.memory_space<vmem>>, vector<8x192xf32>,
    %cst_6 = arith.constant 0.000000e+00 : f32
    %7 = vector.broadcast %cst_6 : f32 to vector<8x32xf32>
    %c0_7 = arith.constant 0 : index
    %c0_8 = arith.constant 0 : index
    %8 = vector.load %arg11[%c0_7, %c0_8] : memref<8x32xf32, #tpu.memory_space<vmem>>, vector<8x32xf32>
    tpu.vector_store %arg11[%c0_7, %c0_8], %7 {strides = array<i32>} : memref<8x32xf32, #tpu.memory_space<vmem>>, vector<8x32xf32>,
    %c0_9 = arith.constant 0 : index
    %9 = memref.load %arg1[%c0_9] : memref<4xi32, #tpu.memory_space<smem>>
    %c0_i32 = arith.constant 0 : i32
    %10 = arith.cmpi sgt, %9, %c0_i32 : i32
    %11 = arith.extui %10 : i1 to i32
    %c0_i32_10 = arith.constant 0 : i32
    %12 = arith.cmpi ne, %11, %c0_i32_10 : i32
    scf.if %12 {
      %c0_33 = arith.constant 0 : index
      %c0_34 = arith.constant 0 : index
      %59 = vector.load %arg10[%c0_33, %c0_34] : memref<8x192xf32, #tpu.memory_space<vmem>>, vector<8x16xf32>
      %c0_35 = arith.constant 0 : index
      %c64 = arith.constant 64 : index
      %60 = vector.load %arg10[%c0_35, %c64] : memref<8x192xf32, #tpu.memory_space<vmem>>, vector<8x16xf32>
      %c0_36 = arith.constant 0 : index
      %c128 = arith.constant 128 : index
      %61 = vector.load %arg10[%c0_36, %c128] : memref<8x192xf32, #tpu.memory_space<vmem>>, vector<8x16xf32>
      %62 = arith.truncf %59 : vector<8x16xf32> to vector<8x16xbf16>
      %63 = arith.truncf %60 : vector<8x16xf32> to vector<8x16xbf16>
      %cst_37 = arith.constant dense<0.000000e+00> : vector<8x8xf32>
      %64 = tpu.matmul %62, %63, %cst_37 {dimension_numbers = #tpu.dot_dimension_numbers<[1], [1], [0], [0], [0, 0, 1, 0], [], []>} : vector<8x16xbf16>, vector<8x16xbf16>, vector<8x8xf32> -> vector<8x8xf32>
      %cst_38 = arith.constant 2.500000e-01 : f32
      %65 = vector.broadcast %cst_38 : f32 to vector<8x8xf32>
      %66 = arith.mulf %64, %65 : vector<8x8xf32>
      %cst_39 = arith.constant dense<0xFF800000> : vector<8xf32>
      %67 = vector.multi_reduction <maximumf>, %66, %cst_39 [1] : vector<8x8xf32> to vector<8xf32>
      %68 = vector.shape_cast %67 : vector<8xf32> to vector<8x1xf32>
      %69 = vector.broadcast %68 : vector<8x1xf32> to vector<8x8xf32>
      %70 = arith.subf %66, %69 : vector<8x8xf32>
      %71 = math.exp %70 : vector<8x8xf32>
      %cst_40 = arith.constant dense<0.000000e+00> : vector<8xf32>
      %72 = vector.multi_reduction <add>, %71, %cst_40 [1] : vector<8x8xf32> to vector<8xf32>
      %73 = vector.shape_cast %72 : vector<8xf32> to vector<8x1xf32>
      %74 = tpu.reciprocal %73 {approx = true} : vector<8x1xf32> -> vector<8x1xf32>
      %75 = vector.broadcast %74 : vector<8x1xf32> to vector<8x8xf32>
      %76 = arith.mulf %71, %75 : vector<8x8xf32>
      %cst_41 = arith.constant 0.699999988 : f32
      %77 = vector.broadcast %cst_41 : f32 to vector<8x8xf32>
      %78 = arith.mulf %77, %76 : vector<8x8xf32>
      %c0_42 = arith.constant 0 : index
      %c0_43 = arith.constant 0 : index
      %c0_44 = arith.constant 0 : index
      %c0_45 = arith.constant 0 : index
      %79 = vector.load %arg3[%c0_42, %c0_43, %c0_44, %c0_45] : memref<1x4x8x8xf32, #tpu.memory_space<vmem>>, vector<1x1x8x8xf32>
      %80 = vector.shape_cast %79 : vector<1x1x8x8xf32> to vector<8x8xf32>
      %cst_46 = arith.constant dense<0xFF800000> : vector<8xf32>
      %81 = vector.multi_reduction <maximumf>, %80, %cst_46 [1] : vector<8x8xf32> to vector<8xf32>
      %82 = vector.shape_cast %81 : vector<8xf32> to vector<8x1xf32>
      %83 = vector.broadcast %82 : vector<8x1xf32> to vector<8x8xf32>
      %84 = arith.subf %80, %83 : vector<8x8xf32>
      %85 = math.exp %84 : vector<8x8xf32>
      %cst_47 = arith.constant dense<0.000000e+00> : vector<8xf32>
      %86 = vector.multi_reduction <add>, %85, %cst_47 [1] : vector<8x8xf32> to vector<8xf32>
      %87 = vector.shape_cast %86 : vector<8xf32> to vector<8x1xf32>
      %88 = tpu.reciprocal %87 {approx = true} : vector<8x1xf32> -> vector<8x1xf32>
      %89 = vector.broadcast %88 : vector<8x1xf32> to vector<8x8xf32>
      %90 = arith.mulf %85, %89 : vector<8x8xf32>
      %cst_48 = arith.constant 3.000000e-01 : f32
      %91 = vector.broadcast %cst_48 : f32 to vector<8x8xf32>
      %92 = arith.mulf %91, %90 : vector<8x8xf32>
      %93 = arith.addf %78, %92 : vector<8x8xf32>
      %94 = arith.truncf %93 : vector<8x8xf32> to vector<8x8xbf16>
      %95 = arith.truncf %61 : vector<8x16xf32> to vector<8x16xbf16>
      %cst_49 = arith.constant dense<0.000000e+00> : vector<8x16xf32>
      %96 = tpu.matmul %94, %95, %cst_49 {dimension_numbers = #tpu.dot_dimension_numbers<[1], [0], [0], [1], [0, 0, 1, 1], [], []>} : vector<8x8xbf16>, vector<8x16xbf16>, vector<8x16xf32> -> vector<8x16xf32>
      %c0_50 = arith.constant 0 : index
      %c0_51 = arith.constant 0 : index
      %97 = vector.load %arg5[%c0_50, %c0_51] : memref<64x32xf32, #tpu.memory_space<vmem>>, vector<16x32xf32>
      %98 = arith.truncf %97 : vector<16x32xf32> to vector<16x32xbf16>
      %c0_52 = arith.constant 0 : index
      %c0_53 = arith.constant 0 : index
      %99 = vector.load %arg11[%c0_52, %c0_53] : memref<8x32xf32, #tpu.memory_space<vmem>>, vector<8x32xf32>
      %100 = arith.truncf %96 : vector<8x16xf32> to vector<8x16xbf16>
      %cst_54 = arith.constant dense<0.000000e+00> : vector<8x32xf32>
      %101 = tpu.matmul %100, %98, %cst_54 {dimension_numbers = #tpu.dot_dimension_numbers<[1], [0], [0], [1], [0, 0, 1, 1], [], []>} : vector<8x16xbf16>, vector<16x32xbf16>, vector<8x32xf32> -> vector<8x32xf32>
      %102 = arith.addf %99, %101 : vector<8x32xf32>
      %c0_55 = arith.constant 0 : index
      %c0_56 = arith.constant 0 : index
      %103 = vector.load %arg11[%c0_55, %c0_56] : memref<8x32xf32, #tpu.memory_space<vmem>>, vector<8x32xf32>
      tpu.vector_store %arg11[%c0_55, %c0_56], %102 {strides = array<i32>} : memref<8x32xf32, #tpu.memory_space<vmem>>, vector<8x32xf32>,
    } else {
    }
    %c1 = arith.constant 1 : index
    %13 = memref.load %arg1[%c1] : memref<4xi32, #tpu.memory_space<smem>>
    %c0_i32_11 = arith.constant 0 : i32
    %14 = arith.cmpi sgt, %13, %c0_i32_11 : i32
    %15 = arith.extui %14 : i1 to i32
    %c0_i32_12 = arith.constant 0 : i32
    %16 = arith.cmpi ne, %15, %c0_i32_12 : i32
    scf.if %16 {
      %c0_33 = arith.constant 0 : index
      %c16 = arith.constant 16 : index
      %59 = vector.load %arg10[%c0_33, %c16] : memref<8x192xf32, #tpu.memory_space<vmem>>, vector<8x16xf32>
      %c0_34 = arith.constant 0 : index
      %c80 = arith.constant 80 : index
      %60 = vector.load %arg10[%c0_34, %c80] : memref<8x192xf32, #tpu.memory_space<vmem>>, vector<8x16xf32>
      %c0_35 = arith.constant 0 : index
      %c144 = arith.constant 144 : index
      %61 = vector.load %arg10[%c0_35, %c144] : memref<8x192xf32, #tpu.memory_space<vmem>>, vector<8x16xf32>
      %62 = arith.truncf %59 : vector<8x16xf32> to vector<8x16xbf16>
      %63 = arith.truncf %60 : vector<8x16xf32> to vector<8x16xbf16>
      %cst_36 = arith.constant dense<0.000000e+00> : vector<8x8xf32>
      %64 = tpu.matmul %62, %63, %cst_36 {dimension_numbers = #tpu.dot_dimension_numbers<[1], [1], [0], [0], [0, 0, 1, 0], [], []>} : vector<8x16xbf16>, vector<8x16xbf16>, vector<8x8xf32> -> vector<8x8xf32>
      %cst_37 = arith.constant 2.500000e-01 : f32
      %65 = vector.broadcast %cst_37 : f32 to vector<8x8xf32>
      %66 = arith.mulf %64, %65 : vector<8x8xf32>
      %cst_38 = arith.constant dense<0xFF800000> : vector<8xf32>
      %67 = vector.multi_reduction <maximumf>, %66, %cst_38 [1] : vector<8x8xf32> to vector<8xf32>
      %68 = vector.shape_cast %67 : vector<8xf32> to vector<8x1xf32>
      %69 = vector.broadcast %68 : vector<8x1xf32> to vector<8x8xf32>
      %70 = arith.subf %66, %69 : vector<8x8xf32>
      %71 = math.exp %70 : vector<8x8xf32>
      %cst_39 = arith.constant dense<0.000000e+00> : vector<8xf32>
      %72 = vector.multi_reduction <add>, %71, %cst_39 [1] : vector<8x8xf32> to vector<8xf32>
      %73 = vector.shape_cast %72 : vector<8xf32> to vector<8x1xf32>
      %74 = tpu.reciprocal %73 {approx = true} : vector<8x1xf32> -> vector<8x1xf32>
      %75 = vector.broadcast %74 : vector<8x1xf32> to vector<8x8xf32>
      %76 = arith.mulf %71, %75 : vector<8x8xf32>
      %cst_40 = arith.constant 0.699999988 : f32
      %77 = vector.broadcast %cst_40 : f32 to vector<8x8xf32>
      %78 = arith.mulf %77, %76 : vector<8x8xf32>
      %c0_41 = arith.constant 0 : index
      %c1_42 = arith.constant 1 : index
      %c0_43 = arith.constant 0 : index
      %c0_44 = arith.constant 0 : index
      %79 = vector.load %arg3[%c0_41, %c1_42, %c0_43, %c0_44] : memref<1x4x8x8xf32, #tpu.memory_space<vmem>>, vector<1x1x8x8xf32>
      %80 = vector.shape_cast %79 : vector<1x1x8x8xf32> to vector<8x8xf32>
      %cst_45 = arith.constant dense<0xFF800000> : vector<8xf32>
      %81 = vector.multi_reduction <maximumf>, %80, %cst_45 [1] : vector<8x8xf32> to vector<8xf32>
      %82 = vector.shape_cast %81 : vector<8xf32> to vector<8x1xf32>
      %83 = vector.broadcast %82 : vector<8x1xf32> to vector<8x8xf32>
      %84 = arith.subf %80, %83 : vector<8x8xf32>
      %85 = math.exp %84 : vector<8x8xf32>
      %cst_46 = arith.constant dense<0.000000e+00> : vector<8xf32>
      %86 = vector.multi_reduction <add>, %85, %cst_46 [1] : vector<8x8xf32> to vector<8xf32>
      %87 = vector.shape_cast %86 : vector<8xf32> to vector<8x1xf32>
      %88 = tpu.reciprocal %87 {approx = true} : vector<8x1xf32> -> vector<8x1xf32>
      %89 = vector.broadcast %88 : vector<8x1xf32> to vector<8x8xf32>
      %90 = arith.mulf %85, %89 : vector<8x8xf32>
      %cst_47 = arith.constant 3.000000e-01 : f32
      %91 = vector.broadcast %cst_47 : f32 to vector<8x8xf32>
      %92 = arith.mulf %91, %90 : vector<8x8xf32>
      %93 = arith.addf %78, %92 : vector<8x8xf32>
      %94 = arith.truncf %93 : vector<8x8xf32> to vector<8x8xbf16>
      %95 = arith.truncf %61 : vector<8x16xf32> to vector<8x16xbf16>
      %cst_48 = arith.constant dense<0.000000e+00> : vector<8x16xf32>
      %96 = tpu.matmul %94, %95, %cst_48 {dimension_numbers = #tpu.dot_dimension_numbers<[1], [0], [0], [1], [0, 0, 1, 1], [], []>} : vector<8x8xbf16>, vector<8x16xbf16>, vector<8x16xf32> -> vector<8x16xf32>
      %c16_49 = arith.constant 16 : index
      %c0_50 = arith.constant 0 : index
      %97 = vector.load %arg5[%c16_49, %c0_50] : memref<64x32xf32, #tpu.memory_space<vmem>>, vector<16x32xf32>
      %98 = arith.truncf %97 : vector<16x32xf32> to vector<16x32xbf16>
      %c0_51 = arith.constant 0 : index
      %c0_52 = arith.constant 0 : index
      %99 = vector.load %arg11[%c0_51, %c0_52] : memref<8x32xf32, #tpu.memory_space<vmem>>, vector<8x32xf32>
      %100 = arith.truncf %96 : vector<8x16xf32> to vector<8x16xbf16>
      %cst_53 = arith.constant dense<0.000000e+00> : vector<8x32xf32>
      %101 = tpu.matmul %100, %98, %cst_53 {dimension_numbers = #tpu.dot_dimension_numbers<[1], [0], [0], [1], [0, 0, 1, 1], [], []>} : vector<8x16xbf16>, vector<16x32xbf16>, vector<8x32xf32> -> vector<8x32xf32>
      %102 = arith.addf %99, %101 : vector<8x32xf32>
      %c0_54 = arith.constant 0 : index
      %c0_55 = arith.constant 0 : index
      %103 = vector.load %arg11[%c0_54, %c0_55] : memref<8x32xf32, #tpu.memory_space<vmem>>, vector<8x32xf32>
      tpu.vector_store %arg11[%c0_54, %c0_55], %102 {strides = array<i32>} : memref<8x32xf32, #tpu.memory_space<vmem>>, vector<8x32xf32>,
    } else {
    }
    %c2 = arith.constant 2 : index
    %17 = memref.load %arg1[%c2] : memref<4xi32, #tpu.memory_space<smem>>
    %c0_i32_13 = arith.constant 0 : i32
    %18 = arith.cmpi sgt, %17, %c0_i32_13 : i32
    %19 = arith.extui %18 : i1 to i32
    %c0_i32_14 = arith.constant 0 : i32
    %20 = arith.cmpi ne, %19, %c0_i32_14 : i32
    scf.if %20 {
      %c0_33 = arith.constant 0 : index
      %c32 = arith.constant 32 : index
      %59 = vector.load %arg10[%c0_33, %c32] : memref<8x192xf32, #tpu.memory_space<vmem>>, vector<8x16xf32>
      %c0_34 = arith.constant 0 : index
      %c96 = arith.constant 96 : index
      %60 = vector.load %arg10[%c0_34, %c96] : memref<8x192xf32, #tpu.memory_space<vmem>>, vector<8x16xf32>
      %c0_35 = arith.constant 0 : index
      %c160 = arith.constant 160 : index
      %61 = vector.load %arg10[%c0_35, %c160] : memref<8x192xf32, #tpu.memory_space<vmem>>, vector<8x16xf32>
      %62 = arith.truncf %59 : vector<8x16xf32> to vector<8x16xbf16>
      %63 = arith.truncf %60 : vector<8x16xf32> to vector<8x16xbf16>
      %cst_36 = arith.constant dense<0.000000e+00> : vector<8x8xf32>
      %64 = tpu.matmul %62, %63, %cst_36 {dimension_numbers = #tpu.dot_dimension_numbers<[1], [1], [0], [0], [0, 0, 1, 0], [], []>} : vector<8x16xbf16>, vector<8x16xbf16>, vector<8x8xf32> -> vector<8x8xf32>
      %cst_37 = arith.constant 2.500000e-01 : f32
      %65 = vector.broadcast %cst_37 : f32 to vector<8x8xf32>
      %66 = arith.mulf %64, %65 : vector<8x8xf32>
      %cst_38 = arith.constant dense<0xFF800000> : vector<8xf32>
      %67 = vector.multi_reduction <maximumf>, %66, %cst_38 [1] : vector<8x8xf32> to vector<8xf32>
      %68 = vector.shape_cast %67 : vector<8xf32> to vector<8x1xf32>
      %69 = vector.broadcast %68 : vector<8x1xf32> to vector<8x8xf32>
      %70 = arith.subf %66, %69 : vector<8x8xf32>
      %71 = math.exp %70 : vector<8x8xf32>
      %cst_39 = arith.constant dense<0.000000e+00> : vector<8xf32>
      %72 = vector.multi_reduction <add>, %71, %cst_39 [1] : vector<8x8xf32> to vector<8xf32>
      %73 = vector.shape_cast %72 : vector<8xf32> to vector<8x1xf32>
      %74 = tpu.reciprocal %73 {approx = true} : vector<8x1xf32> -> vector<8x1xf32>
      %75 = vector.broadcast %74 : vector<8x1xf32> to vector<8x8xf32>
      %76 = arith.mulf %71, %75 : vector<8x8xf32>
      %cst_40 = arith.constant 0.699999988 : f32
      %77 = vector.broadcast %cst_40 : f32 to vector<8x8xf32>
      %78 = arith.mulf %77, %76 : vector<8x8xf32>
      %c0_41 = arith.constant 0 : index
      %c2_42 = arith.constant 2 : index
      %c0_43 = arith.constant 0 : index
      %c0_44 = arith.constant 0 : index
      %79 = vector.load %arg3[%c0_41, %c2_42, %c0_43, %c0_44] : memref<1x4x8x8xf32, #tpu.memory_space<vmem>>, vector<1x1x8x8xf32>
      %80 = vector.shape_cast %79 : vector<1x1x8x8xf32> to vector<8x8xf32>
      %cst_45 = arith.constant dense<0xFF800000> : vector<8xf32>
      %81 = vector.multi_reduction <maximumf>, %80, %cst_45 [1] : vector<8x8xf32> to vector<8xf32>
      %82 = vector.shape_cast %81 : vector<8xf32> to vector<8x1xf32>
      %83 = vector.broadcast %82 : vector<8x1xf32> to vector<8x8xf32>
      %84 = arith.subf %80, %83 : vector<8x8xf32>
      %85 = math.exp %84 : vector<8x8xf32>
      %cst_46 = arith.constant dense<0.000000e+00> : vector<8xf32>
      %86 = vector.multi_reduction <add>, %85, %cst_46 [1] : vector<8x8xf32> to vector<8xf32>
      %87 = vector.shape_cast %86 : vector<8xf32> to vector<8x1xf32>
      %88 = tpu.reciprocal %87 {approx = true} : vector<8x1xf32> -> vector<8x1xf32>
      %89 = vector.broadcast %88 : vector<8x1xf32> to vector<8x8xf32>
      %90 = arith.mulf %85, %89 : vector<8x8xf32>
      %cst_47 = arith.constant 3.000000e-01 : f32
      %91 = vector.broadcast %cst_47 : f32 to vector<8x8xf32>
      %92 = arith.mulf %91, %90 : vector<8x8xf32>
      %93 = arith.addf %78, %92 : vector<8x8xf32>
      %94 = arith.truncf %93 : vector<8x8xf32> to vector<8x8xbf16>
      %95 = arith.truncf %61 : vector<8x16xf32> to vector<8x16xbf16>
      %cst_48 = arith.constant dense<0.000000e+00> : vector<8x16xf32>
      %96 = tpu.matmul %94, %95, %cst_48 {dimension_numbers = #tpu.dot_dimension_numbers<[1], [0], [0], [1], [0, 0, 1, 1], [], []>} : vector<8x8xbf16>, vector<8x16xbf16>, vector<8x16xf32> -> vector<8x16xf32>
      %c32_49 = arith.constant 32 : index
      %c0_50 = arith.constant 0 : index
      %97 = vector.load %arg5[%c32_49, %c0_50] : memref<64x32xf32, #tpu.memory_space<vmem>>, vector<16x32xf32>
      %98 = arith.truncf %97 : vector<16x32xf32> to vector<16x32xbf16>
      %c0_51 = arith.constant 0 : index
      %c0_52 = arith.constant 0 : index
      %99 = vector.load %arg11[%c0_51, %c0_52] : memref<8x32xf32, #tpu.memory_space<vmem>>, vector<8x32xf32>
      %100 = arith.truncf %96 : vector<8x16xf32> to vector<8x16xbf16>
      %cst_53 = arith.constant dense<0.000000e+00> : vector<8x32xf32>
      %101 = tpu.matmul %100, %98, %cst_53 {dimension_numbers = #tpu.dot_dimension_numbers<[1], [0], [0], [1], [0, 0, 1, 1], [], []>} : vector<8x16xbf16>, vector<16x32xbf16>, vector<8x32xf32> -> vector<8x32xf32>
      %102 = arith.addf %99, %101 : vector<8x32xf32>
      %c0_54 = arith.constant 0 : index
      %c0_55 = arith.constant 0 : index
      %103 = vector.load %arg11[%c0_54, %c0_55] : memref<8x32xf32, #tpu.memory_space<vmem>>, vector<8x32xf32>
      tpu.vector_store %arg11[%c0_54, %c0_55], %102 {strides = array<i32>} : memref<8x32xf32, #tpu.memory_space<vmem>>, vector<8x32xf32>,
    } else {
    }
    %c3 = arith.constant 3 : index
    %21 = memref.load %arg1[%c3] : memref<4xi32, #tpu.memory_space<smem>>
    %c0_i32_15 = arith.constant 0 : i32
    %22 = arith.cmpi sgt, %21, %c0_i32_15 : i32
    %23 = arith.extui %22 : i1 to i32
    %c0_i32_16 = arith.constant 0 : i32
    %24 = arith.cmpi ne, %23, %c0_i32_16 : i32
    scf.if %24 {
      %c0_33 = arith.constant 0 : index
      %c48 = arith.constant 48 : index
      %59 = vector.load %arg10[%c0_33, %c48] : memref<8x192xf32, #tpu.memory_space<vmem>>, vector<8x16xf32>
      %c0_34 = arith.constant 0 : index
      %c112 = arith.constant 112 : index
      %60 = vector.load %arg10[%c0_34, %c112] : memref<8x192xf32, #tpu.memory_space<vmem>>, vector<8x16xf32>
      %c0_35 = arith.constant 0 : index
      %c176 = arith.constant 176 : index
      %61 = vector.load %arg10[%c0_35, %c176] : memref<8x192xf32, #tpu.memory_space<vmem>>, vector<8x16xf32>
      %62 = arith.truncf %59 : vector<8x16xf32> to vector<8x16xbf16>
      %63 = arith.truncf %60 : vector<8x16xf32> to vector<8x16xbf16>
      %cst_36 = arith.constant dense<0.000000e+00> : vector<8x8xf32>
      %64 = tpu.matmul %62, %63, %cst_36 {dimension_numbers = #tpu.dot_dimension_numbers<[1], [1], [0], [0], [0, 0, 1, 0], [], []>} : vector<8x16xbf16>, vector<8x16xbf16>, vector<8x8xf32> -> vector<8x8xf32>
      %cst_37 = arith.constant 2.500000e-01 : f32
      %65 = vector.broadcast %cst_37 : f32 to vector<8x8xf32>
      %66 = arith.mulf %64, %65 : vector<8x8xf32>
      %cst_38 = arith.constant dense<0xFF800000> : vector<8xf32>
      %67 = vector.multi_reduction <maximumf>, %66, %cst_38 [1] : vector<8x8xf32> to vector<8xf32>
      %68 = vector.shape_cast %67 : vector<8xf32> to vector<8x1xf32>
      %69 = vector.broadcast %68 : vector<8x1xf32> to vector<8x8xf32>
      %70 = arith.subf %66, %69 : vector<8x8xf32>
      %71 = math.exp %70 : vector<8x8xf32>
      %cst_39 = arith.constant dense<0.000000e+00> : vector<8xf32>
      %72 = vector.multi_reduction <add>, %71, %cst_39 [1] : vector<8x8xf32> to vector<8xf32>
      %73 = vector.shape_cast %72 : vector<8xf32> to vector<8x1xf32>
      %74 = tpu.reciprocal %73 {approx = true} : vector<8x1xf32> -> vector<8x1xf32>
      %75 = vector.broadcast %74 : vector<8x1xf32> to vector<8x8xf32>
      %76 = arith.mulf %71, %75 : vector<8x8xf32>
      %cst_40 = arith.constant 0.699999988 : f32
      %77 = vector.broadcast %cst_40 : f32 to vector<8x8xf32>
      %78 = arith.mulf %77, %76 : vector<8x8xf32>
      %c0_41 = arith.constant 0 : index
      %c3_42 = arith.constant 3 : index
      %c0_43 = arith.constant 0 : index
      %c0_44 = arith.constant 0 : index
      %79 = vector.load %arg3[%c0_41, %c3_42, %c0_43, %c0_44] : memref<1x4x8x8xf32, #tpu.memory_space<vmem>>, vector<1x1x8x8xf32>
      %80 = vector.shape_cast %79 : vector<1x1x8x8xf32> to vector<8x8xf32>
      %cst_45 = arith.constant dense<0xFF800000> : vector<8xf32>
      %81 = vector.multi_reduction <maximumf>, %80, %cst_45 [1] : vector<8x8xf32> to vector<8xf32>
      %82 = vector.shape_cast %81 : vector<8xf32> to vector<8x1xf32>
      %83 = vector.broadcast %82 : vector<8x1xf32> to vector<8x8xf32>
      %84 = arith.subf %80, %83 : vector<8x8xf32>
      %85 = math.exp %84 : vector<8x8xf32>
      %cst_46 = arith.constant dense<0.000000e+00> : vector<8xf32>
      %86 = vector.multi_reduction <add>, %85, %cst_46 [1] : vector<8x8xf32> to vector<8xf32>
      %87 = vector.shape_cast %86 : vector<8xf32> to vector<8x1xf32>
      %88 = tpu.reciprocal %87 {approx = true} : vector<8x1xf32> -> vector<8x1xf32>
      %89 = vector.broadcast %88 : vector<8x1xf32> to vector<8x8xf32>
      %90 = arith.mulf %85, %89 : vector<8x8xf32>
      %cst_47 = arith.constant 3.000000e-01 : f32
      %91 = vector.broadcast %cst_47 : f32 to vector<8x8xf32>
      %92 = arith.mulf %91, %90 : vector<8x8xf32>
      %93 = arith.addf %78, %92 : vector<8x8xf32>
      %94 = arith.truncf %93 : vector<8x8xf32> to vector<8x8xbf16>
      %95 = arith.truncf %61 : vector<8x16xf32> to vector<8x16xbf16>
      %cst_48 = arith.constant dense<0.000000e+00> : vector<8x16xf32>
      %96 = tpu.matmul %94, %95, %cst_48 {dimension_numbers = #tpu.dot_dimension_numbers<[1], [0], [0], [1], [0, 0, 1, 1], [], []>} : vector<8x8xbf16>, vector<8x16xbf16>, vector<8x16xf32> -> vector<8x16xf32>
      %c48_49 = arith.constant 48 : index
      %c0_50 = arith.constant 0 : index
      %97 = vector.load %arg5[%c48_49, %c0_50] : memref<64x32xf32, #tpu.memory_space<vmem>>, vector<16x32xf32>
      %98 = arith.truncf %97 : vector<16x32xf32> to vector<16x32xbf16>
      %c0_51 = arith.constant 0 : index
      %c0_52 = arith.constant 0 : index
      %99 = vector.load %arg11[%c0_51, %c0_52] : memref<8x32xf32, #tpu.memory_space<vmem>>, vector<8x32xf32>
      %100 = arith.truncf %96 : vector<8x16xf32> to vector<8x16xbf16>
      %cst_53 = arith.constant dense<0.000000e+00> : vector<8x32xf32>
      %101 = tpu.matmul %100, %98, %cst_53 {dimension_numbers = #tpu.dot_dimension_numbers<[1], [0], [0], [1], [0, 0, 1, 1], [], []>} : vector<8x16xbf16>, vector<16x32xbf16>, vector<8x32xf32> -> vector<8x32xf32>
      %102 = arith.addf %99, %101 : vector<8x32xf32>
      %c0_54 = arith.constant 0 : index
      %c0_55 = arith.constant 0 : index
      %103 = vector.load %arg11[%c0_54, %c0_55] : memref<8x32xf32, #tpu.memory_space<vmem>>, vector<8x32xf32>
      tpu.vector_store %arg11[%c0_54, %c0_55], %102 {strides = array<i32>} : memref<8x32xf32, #tpu.memory_space<vmem>>, vector<8x32xf32>,
    } else {
    }
    %c0_17 = arith.constant 0 : index
    %c0_18 = arith.constant 0 : index
    %25 = vector.load %arg11[%c0_17, %c0_18] : memref<8x32xf32, #tpu.memory_space<vmem>>, vector<8x32xf32>
    %c0_19 = arith.constant 0 : index
    %c0_20 = arith.constant 0 : index
    %26 = vector.load %arg6[%c0_19, %c0_20] : memref<1x32xf32, #tpu.memory_space<vmem>>, vector<1x32xf32>
    %27 = vector.broadcast %26 : vector<1x32xf32> to vector<8x32xf32>
    %28 = arith.addf %25, %27 : vector<8x32xf32>
    %29 = arith.addf %28, %1 : vector<8x32xf32>
    %cst_21 = arith.constant dense<0.000000e+00> : vector<8xf32>
    %30 = vector.multi_reduction <add>, %29, %cst_21 [1] : vector<8x32xf32> to vector<8xf32>
    %31 = vector.shape_cast %30 : vector<8xf32> to vector<8x1xf32>
    %cst_22 = arith.constant 3.200000e+01 : f32
    %32 = vector.broadcast %cst_22 : f32 to vector<8x1xf32>
    %33 = arith.divf %31, %32 : vector<8x1xf32>
    %34 = vector.broadcast %33 : vector<8x1xf32> to vector<8x32xf32>
    %35 = arith.subf %29, %34 : vector<8x32xf32>
    %36 = vector.broadcast %33 : vector<8x1xf32> to vector<8x32xf32>
    %37 = arith.subf %29, %36 : vector<8x32xf32>
    %38 = arith.mulf %35, %37 : vector<8x32xf32>
    %cst_23 = arith.constant dense<0.000000e+00> : vector<8xf32>
    %39 = vector.multi_reduction <add>, %38, %cst_23 [1] : vector<8x32xf32> to vector<8xf32>
    %40 = vector.shape_cast %39 : vector<8xf32> to vector<8x1xf32>
    %cst_24 = arith.constant 3.200000e+01 : f32
    %41 = vector.broadcast %cst_24 : f32 to vector<8x1xf32>
    %42 = arith.divf %40, %41 : vector<8x1xf32>
    %43 = vector.broadcast %33 : vector<8x1xf32> to vector<8x32xf32>
    %44 = arith.subf %29, %43 : vector<8x32xf32>
    %cst_25 = arith.constant 9.99999974E-6 : f32
    %45 = vector.broadcast %cst_25 : f32 to vector<8x1xf32>
    %46 = arith.addf %42, %45 : vector<8x1xf32>
    %47 = math.rsqrt %46 : vector<8x1xf32>
    %48 = vector.broadcast %47 : vector<8x1xf32> to vector<8x32xf32>
    %49 = arith.mulf %44, %48 : vector<8x32xf32>
    %c0_26 = arith.constant 0 : index
    %c0_27 = arith.constant 0 : index
    %50 = vector.load %arg7[%c0_26, %c0_27] : memref<1x32xf32, #tpu.memory_space<vmem>>, vector<1x32xf32>
    %51 = vector.broadcast %50 : vector<1x32xf32> to vector<8x32xf32>
    %52 = arith.mulf %49, %51 : vector<8x32xf32>
    %c0_28 = arith.constant 0 : index
    %c0_29 = arith.constant 0 : index
    %53 = vector.load %arg8[%c0_28, %c0_29] : memref<1x32xf32, #tpu.memory_space<vmem>>, vector<1x32xf32>
    %54 = vector.broadcast %53 : vector<1x32xf32> to vector<8x32xf32>
    %55 = arith.addf %52, %54 : vector<8x32xf32>
    %c0_30 = arith.constant 0 : index
    %c0_31 = arith.constant 0 : index
    %c0_32 = arith.constant 0 : index
    %56 = vector.load %arg9[%c0_30, %c0_31, %c0_32] : memref<1x8x32xf32, #tpu.memory_space<vmem>>, vector<1x8x32xf32>
    %57 = vector.shape_cast %56 : vector<1x8x32xf32> to vector<8x32xf32>
    %58 = vector.shape_cast %55 : vector<8x32xf32> to vector<1x8x32xf32>
    tpu.vector_store %arg9[%c0_30, %c0_31, %c0_32], %58 {strides = array<i32>} : memref<1x8x32xf32, #tpu.memory_space<vmem>>, vector<1x8x32xf32>,
    return
  }
  func.func @transform_0(%arg0: i32, %arg1: memref<4xi32, #tpu.memory_space<smem>>) -> (i32, i32, i32) {
    %c0_i32 = arith.constant 0 : i32
    %c0_i32_0 = arith.constant 0 : i32
    %c0_i32_1 = arith.constant 0 : i32
    return %arg0, %c0_i32, %c0_i32_0 : i32, i32, i32
  }
  func.func @transform_1(%arg0: i32, %arg1: memref<4xi32, #tpu.memory_space<smem>>) -> (i32, i32, i32, i32) {
    %c0_i32 = arith.constant 0 : i32
    %c0_i32_0 = arith.constant 0 : i32
    %c0_i32_1 = arith.constant 0 : i32
    %c0_i32_2 = arith.constant 0 : i32
    return %arg0, %c0_i32, %c0_i32_0, %c0_i32_1 : i32, i32, i32, i32
  }
  func.func @transform_2(%arg0: i32, %arg1: memref<4xi32, #tpu.memory_space<smem>>) -> (i32, i32) {
    %c0_i32 = arith.constant 0 : i32
    %c0_i32_0 = arith.constant 0 : i32
    %c0_i32_1 = arith.constant 0 : i32
    return %c0_i32, %c0_i32_0 : i32, i32
  }
  func.func @transform_3(%arg0: i32, %arg1: memref<4xi32, #tpu.memory_space<smem>>) -> (i32, i32) {
    %c0_i32 = arith.constant 0 : i32
    %c0_i32_0 = arith.constant 0 : i32
    %c0_i32_1 = arith.constant 0 : i32
    return %c0_i32, %c0_i32_0 : i32, i32
  }
  func.func @transform_4(%arg0: i32, %arg1: memref<4xi32, #tpu.memory_space<smem>>) -> (i32, i32) {
    %c0_i32 = arith.constant 0 : i32
    %c0_i32_0 = arith.constant 0 : i32
    %c0_i32_1 = arith.constant 0 : i32
    return %c0_i32, %c0_i32_0 : i32, i32
  }
  func.func @transform_5(%arg0: i32, %arg1: memref<4xi32, #tpu.memory_space<smem>>) -> (i32, i32) {
    %c0_i32 = arith.constant 0 : i32
    %c0_i32_0 = arith.constant 0 : i32
    %c0_i32_1 = arith.constant 0 : i32
    return %c0_i32, %c0_i32_0 : i32, i32
  }
  func.func @transform_6(%arg0: i32, %arg1: memref<4xi32, #tpu.memory_space<smem>>) -> (i32, i32) {
    %c0_i32 = arith.constant 0 : i32
    %c0_i32_0 = arith.constant 0 : i32
    %c0_i32_1 = arith.constant 0 : i32
    return %c0_i32, %c0_i32_0 : i32, i32
  }
  func.func @transform_7(%arg0: i32, %arg1: memref<4xi32, #tpu.memory_space<smem>>) -> (i32, i32, i32) {
    %c0_i32 = arith.constant 0 : i32
    %c0_i32_0 = arith.constant 0 : i32
    %c0_i32_1 = arith.constant 0 : i32
    return %arg0, %c0_i32, %c0_i32_0 : i32, i32, i32
  }
}

</mosaic_0001>

<bundles_post_ra>
// kernel: tpu_custom_call.1
= control target key start
LH: loop header
LB: loop body
LE: loop exit
PB: predicated region body
PF: predicated region fallthrough
CT: control target
= control target key end

     0   :  { %s1970_s0 = inlined_call_operand.vmem [shape: s32[4], index: 0, kind: input, shape index: {}]   ;;  %s1971_s1 = inlined_call_operand.vmem [shape: f32[2,8,32], index: 1, kind: input, shape index: {}]   ;;  %s1972_s2 = inlined_call_operand.vmem [shape: f32[2,4,8,8], index: 2, kind: input, shape index: {}]   ;;  %s1973_s3 = inlined_call_operand.hbm [shape: f32[32,192], index: 3, kind: input, shape index: {}]   ;;  %s1974_s4 = inlined_call_operand.vmem [shape: f32[64,32], index: 4, kind: input, shape index: {}]   ;;  %s1975_s5 = inlined_call_operand.vmem [shape: f32[1,32], index: 5, kind: input, shape index: {}]   ;;  %s1976_s6 = inlined_call_operand.vmem [shape: f32[1,32], index: 6, kind: input, shape index: {}]   ;;  %s1977_s7 = inlined_call_operand.vmem [shape: f32[1,32], index: 7, kind: input, shape index: {}]   ;;  %s1978_s8 = inlined_call_operand.hbm [shape: f32[2,8,32], index: 8, kind: output, shape index: {}]  }
   0x1   :  { %s13_s29 = sshll.u32 %s1970_s0, 4  ;;  %s14_s29 = int_to_ptr.vmem [resolvable:$true] %s13_s29 }
   0x2   :  { %s1517_s30 = scalar_lea.vmem %s14_s29, 16  ;;  %p1522_p1 = scmp.lt.s32.totalorder %s14_s29, %s14_s29 }
   0x3   :  { %p1518_p0 = scmp.ne.s32.totalorder %s14_s29, %s1517_s30  ;;  %p1523_p2 = scmp.lt.s32.totalorder %s1517_s30, %s1517_s30 }
   0x5   :  { %p1524_p3 = por %p1523_p2, %p1522_p1 }
   0x7   :  { %p1525_p4 = pnand %p1524_p3, %p1518_p0 }
   0x9   :  { %1528 = shalt.err (!%p1525_p4)  }
   0xa   :  { %s1627_s9 = smov [#allocation5]  }
   0xb   :  { %16 = dma.vmem_to_smem %s14_s29, 16, %s1627_s9, [#allocation4] }
   0xc   :  { %1601 = dma.done.wait [#allocation4], 16 }
   0xd   :  { %1602 = vsyncadd [#allocation4], 4294967280 }
   0xe   :  { %18 = sfence }
   0xf   :  { %19 = vsyncpa [#allocation7], 0 }
  0x10   :  { %20 = vsyncpa [#allocation8], 0 }
  0x11   :  { %22 = vsyncpa [#allocation8 + $0x1], 0  ;;  %s1697_s10 = smov 0   ;;  %s1699_s11 = smov 0  }
  0x12   :  { %s1701_s0 = smov 0   ;;  %s1703_s12 = smov 0  }
  0x13 LB: > { %s1718_s13 = sadd.s32 4294967295, %s1625_s12   ;;  %s1276_s14 = sadd.s32 4294967294, %s1625_s12   ;;  %s1625_s12 = sphi %s1703_s12, %s1994_s12   ;;  %s1621_s0 = sphi %s1701_s0, %s1993_s0   ;;  %s1617_s11 = sphi %s1699_s11, %s1992_s11   ;;  %s1613_s10 = sphi %s1697_s10, %s1991_s10  }
  0x14   : > { %s1722_s15 = sadd.s32 1, %s1625_s12   ;;  %s192_s16 = sadd.s32 1, %s1621_s0 }
  0x15   : > { %s189_s17 = ssub.s32 %s1625_s12, %s1722_s15  ;;  %p202_p5 = scmp.ne.s32.totalorder %s1621_s0, %s1617_s11 }
  0x16   : > { %p190_p6 = scmp.eq.s32.totalorder %s189_s17, 0  ;;  %p203_p7 = scmp.eq.s32.totalorder %s1718_s13, 1 }
  0x17   : > { %p208_p8 = scmp.ne.s32.totalorder %s1617_s11, %s1613_s10  ;;  %p209_p9 = scmp.eq.s32.totalorder %s1276_s14, 1 }
  0x18   : > { %s1733_s18 = scalar_select %p190_p6, %s1621_s0, %s192_s16  }
  0x19   : > { %p1735_p10 = por %p203_p7, %p202_p5  ;;  %p1739_p11 = por %p209_p9, %p208_p8 }
  0x1a   : > { %p1277_p12 = scmp.ge.s32.totalorder %s1625_s12, 1  ;;  %p216_p13 = scmp.lt.s32.totalorder %s1625_s12, 3 }
  0x1b   : > { %s1982_s19 = scalar_select %p1735_p10, 1, 0 }
  0x1c   : > { %s1983_s20 = scalar_select %p1739_p11, 1, 0 }
  0x1d   : > { %p1979_p0 = scmp.eq.s32.totalorder %s1718_s13, 0  ;;  %p1746_p1 = pnand %p1277_p12, %p216_p13 }
  0x1e   : > { %s1628_s22 = smov [#allocation6]   ;;  %s1529_s27 = scalar_lea.hbm %s1973_s3, 1024 }
  0x1f   : > { %s1984_s21 = scalar_select %p1746_p1, 1, 0 }
  0x20   : > { %s228_s23 = sshll.u32 %s1628_s22, 4  ;;  %p1419_p2 = pneg %p1746_p1  ;;  %s229_s23 = int_to_ptr.vmem [resolvable:$true] %s228_s23 }
  0x21   : > { %p1530_p4 = scmp.ne.s32.totalorder %s1973_s3, %s1529_s27  ;;  %p1536_p8 = scmp.lt.u32.totalorder %s1529_s27, %s1973_s3 }
  0x22   : > { %p1754_p3 = pnand %p1979_p0, %p1419_p2 }
  0x24   : > { %p1531_p5 = pneg %p1754_p3 }
  0x26   : > { %p1532_p6 = pnand %p1531_p5, %p1530_p4 }
  0x28   : > { %p1533_p7 = pneg %p1532_p6 }
  0x2a   : > { %p1538_p9 = pnand %p1536_p8, %p1533_p7 }
  0x2c   : > { %1541 = shalt.err (!%p1538_p9)
}
  0x2d   : > { %s1542_s14 = scalar_lea.vmem %s229_s23, 1024  ;;  %p1550_p0 = scmp.lt.s32.totalorder %s229_s23, %s229_s23 }
  0x2e   : > { %p1543_p12 = scmp.ne.s32.totalorder %s229_s23, %s1542_s14  ;;  %p1551_p11 = scmp.lt.s32.totalorder %s1542_s14, %s1542_s14 }
  0x30   : > { %p1545_p13 = pnand %p1543_p12, %p1531_p5  ;;  %p1552_p10 = por %p1551_p11, %p1550_p0 }
  0x32   : > { %p1546_p2 = pneg %p1545_p13 }
  0x34   : > { %p1553_p1 = pnand %p1552_p10, %p1546_p2 }
  0x36   : > { %1556 = shalt.err (!%p1553_p1)
}
  0x37   : > { %s1629_s16 = smov 256   ;;  %s1630_s17 = smov 16  }
  0x38   : > { %1422 = dma.hbm_to_vmem [thread:$0]  (!%p1754_p3), %s1973_s3, 1024, %s229_s23, [#allocation7], %s1629_s16, %s1629_s16, %s1630_s17  }
  0x39   : > { %p1986_p4 = scmp.ne.s32.totalorder %s1984_s21, 0 }
  0x3a   : > { %p1987_p6 = scmp.eq.s32.totalorder (!%p1986_p4), %s1718_s13, 0 }
  0x3b   : > { %271 = sbr.rel (%p1986_p4) target bundleno = 5029 (0x13a5), region = 48 }
  0x42   : > { %1604 = dma.done.wait (%p1987_p6), [#allocation7], 1024   ;;  %p1988_p5 = pmov %p1987_p6 }
  0x43   : > { %s304_s26 = sand.u32 1, %s1617_s11   ;;  %p307_p10 = scmp.lt.s32.totalorder %s1718_s13, 1  ;;  %v1631_v0 = vmov 0   ;;  %vm331_vm0 = vcmask 261120   ;;  %v1632_v1 = vmov 0.0   ;;  %v320_v2 = vld [vmem:[#allocation6 + $0x8] sm:$0xff] }
  0x44   : > { %1606 = vsyncadd (%p1988_p5), [#allocation7], 4294966272  ;;  %s1782_s24 = sld [smem:[#allocation5]]  ;;  %s1786_s27 = sshll.u32 %s304_s26, 3  ;;  %367 = vmatprep.mubr.bf16.mxu0 %v1631_v0  ;;  %379 = vst.msk [vmem:[#allocation3] sm:$0xff] %vm331_vm0, %v1632_v1  ;;  %v322_v3 = vld [vmem:[#allocation6 + $0x18] sm:$0xff] }
  0x45   : > { %s308_s21 = scalar_select %p307_p10, %s1718_s13, 1  ;;  %v319_v4 = vld [vmem:[#allocation6] sm:$0xff]  ;;  %v328_v5 = vpack.c.bf16 %v322_v3, %v320_v2  ;;  %v321_v6 = vld [vmem:[#allocation6 + $0x10] sm:$0xff]  ;;  %v324_v7 = vld [vmem:[#allocation6 + $0x28] sm:$0xff]  ;;  %vm377_vm1 = vcmask 523264  }
  0x46   : > { %v326_v8 = vld [vmem:[#allocation6 + $0x38] sm:$0xff]  ;;  %v327_v9 = vpack.c.bf16 %v321_v6, %v319_v4  ;;  %v323_v11 = vld [vmem:[#allocation6 + $0x20] sm:$0xff]  ;;  %v325_v12 = vld [vmem:[#allocation6 + $0x30] sm:$0xff]  ;;  %s306_s22 = scalar_lea.vmem [#allocation9], %s1786_s27 }
  0x47   : > { %s1283_s23 = sshll.u32 %s308_s21, 3  ;;  %s1316_s28 = sshll.u32 %s308_s21, 5  ;;  %v330_v10 = vpack.c.bf16 %v326_v8, %v324_v7  ;;  %335 = vmatprep.subr.bf16.mxu0 %v328_v5  ;;  %v329_v13 = vpack.c.bf16 %v325_v12, %v323_v11 }
  0x48   : > { %s1793_s9 = scalar_lea.vmem %s1972_s2, %s1316_s28  ;;  %s310_s17 = scalar_lea.vmem %s1971_s1, %s1283_s23  ;;  %336 = vmatpush1.bf16.msra.mxu0 %v327_v9 }
  0x49   : > { %v1798_v14 = vld [vmem:[%s310_s17] sm:$0xff]  ;;  %337 = vmatprep.subr.bf16.mxu0 %v330_v10 }
  0x4a   : > { %v318_v15 = vpack.c.bf16 %v1798_v14, %v1798_v14  ;;  %p1287_p11 = scmp.le.s32.totalorder %s1782_s24, 0 }
  0x4b   : > { %v1633_v22 = vmov (!%p1287_p11), 0.0   ;;  %vm1634_vm2 = vmmov (!%p1287_p11), 0   ;;  %s1635_s25 = smov (!%p1287_p11), 64   ;;  %vm391_vm3 = vcmask (!%p1287_p11), 130048   ;;  %vm439_vm4 = vcmask (!%p1287_p11), 64512   ;;  %v452_v25 = vld [vmem:[%s1793_s9] sm:$0xff] (!%p1287_p11) }
  0x4c   : > { %338 = vmatpush1.bf16.msra.mxu0 %v329_v13  ;;  %1347 = vmatprep.subr.bf16.mxu1 (!%p1287_p11), %v1633_v22  ;;  %v453_v26 = vsel (!%p1287_p11), %vm439_vm4, %v452_v25, -inf  ;;  %vm471_vm5 = vcmask (!%p1287_p11), 1043456   ;;  %v515_v54 = vld [vmem:[%s1974_s4] sm:$0xff] (!%p1287_p11)  ;;  %v516_v55 = vld [vmem:[%s1974_s4 + $0x8] sm:$0xff] (!%p1287_p11)  ;;  %v518_v0 = vld [vmem:[#allocation3] sm:$0xff] (!%p1287_p11) }
  0x4d   : > { %1341 = vmatprep.subr.bf16.mxu0 (!%p1287_p11), %v1633_v22  ;;  %1349 = vmatprep.mubr.msk.bf16.mxu1 (!%p1287_p11), %vm1634_vm2, %v1633_v22  ;;  %v517_v57 = vpack.c.bf16 (!%p1287_p11), %v516_v55, %v515_v54 }
  0x4e   : > { %454 = vmax.xlane.f32.xlu1 (!%p1287_p11), %v453_v26 }
  0x4f   : > { %1286 = vmatmul.mubr.msk.bf16.vlgmr.msra.gmra.mrb[0].mxu0 %vm331_vm0, %v318_v15 }
  0x50   : > { %1343 = vmatprep.mubr.msk.bf16.mxu0 (!%p1287_p11), %vm1634_vm2, %v1633_v22 }
  0xdb   : > { %v455_v33 = vpop.xlane.xlu1 (!%p1287_p11), %454 }
  0xdc   : > { %v456_v34 = vsub.f32 (!%p1287_p11), %v452_v25, %v455_v33 }
  0xde   : > { %v457_v36 = vmul.f32 (!%p1287_p11), 1.442695, %v456_v34 }
  0xe0   : > { %1483 = vpow2.f32 (!%p1287_p11), %v457_v36 }
  0xea   : > { %v1484_v39 = vpop.eup (!%p1287_p11), %1483 }
  0xeb   : > { %v459_v42 = vsel (!%p1287_p11), %vm439_vm4, %v1484_v39, 0.0 }
 0x11f   : > { %384 = sbr.rel (%p1287_p11) target bundleno = 1391 (0x56f), region = 56 }
 0x122   : > { %v369_v16 = vpop.f32.mrb[0].mxu0 }
 0x123   : > { %376 = vst [vmem:[#allocation2] sm:$0xff] %v369_v16  ;;  %v371_v17 = vpop.f32.mrb[1].mxu0 }
 0x124   : > { %378 = vst.msk [vmem:[#allocation2 + $0x8] sm:$0xff] %vm377_vm1, %v371_v17  ;;  %v373_v18 = vpop.f32.mrb[2].mxu0 }
 0x125   : > { %v374_v19 = vpop.f32.mrb[3].mxu0 }
 0x12a   : > { %v385_v20 = vld [vmem:[#allocation2] sm:$0xff] }
 0x12b   : > { %v387_v21 = vpack.c.bf16 %v385_v20, %v385_v20  ;;  %v386_v43 = vld [vmem:[#allocation2 + $0x8] sm:$0xff] }
 0x12c   : > { %v467_v44 = vpack.c.bf16 %v386_v43, %v386_v43 }
 0x12d   : > { %389 = vrot.lane.b32.xlu0 %v387_v21, %s1635_s25 }
 0x12e   : > { %v473_v45 = vsel %vm471_vm5, %v467_v44, 0 }
 0x12f   : > { %1348 = vmatpush3.bf16.msra.mxu1 %v473_v45 }
 0x130   : > { %1353 = vmatprep.subr.bf16.mxu1 %v1633_v22 }
 0x19f   : > { %v390_v23 = vpop.permute.xlu0 %389 }
 0x1a0   : > { %v396_v24 = vsel %vm391_vm3, %v390_v23, 0 }
 0x1a1   : > { %1342 = vmatpush3.bf16.xpose.msra.mxu0 %v396_v24 }
 0x1a8   : > { %1344 = vmatmul.mubr.msk.bf16.vlgmr.msra.gmra.mrb[0].mxu0 %vm391_vm3, %v387_v21 }
 0x27b   : > { %v432_v27 = vpop.f32.mrb[0].mxu0 }
 0x27c   : > { %v438_v28 = vmul.f32 0.25, %v432_v27  ;;  %v1345_v29 = vpop.f32.mrb[1].mxu0 }
 0x27d   : > { %v435_v30 = vpop.f32.mrb[2].mxu0 }
 0x27e   : > { %v1346_v31 = vpop.f32.mrb[3].mxu0  ;;  %v440_v32 = vsel %vm439_vm4, %v438_v28, -inf }
 0x27f   : > { %441 = vmax.xlane.f32.xlu0 %v440_v32 }
 0x30c   : > { %v442_v35 = vpop.xlane.xlu0 %441 }
 0x30d   : > { %v443_v37 = vsub.f32 %v438_v28, %v442_v35 }
 0x30f   : > { %v444_v38 = vmul.f32 1.442695, %v443_v37 }
 0x311   : > { %1485 = vpow2.f32 %v444_v38 }
 0x31b   : > { %v1486_v40 = vpop.eup %1485 }
 0x31c   : > { %v446_v41 = vsel %vm439_vm4, %v1486_v40, 0.0 }
 0x31d   : > { %447 = vadd.xlane.f32.xlu1 %v446_v41 }
 0x321   : > { %460 = vadd.xlane.f32.xlu1 %v459_v42 }
 0x3aa   : > { %v448_v46 = vpop.xlane.xlu1 %447 }
 0x3ab   : > { %1487 = vrcp.f32 %v448_v46 }
 0x3ae   : > { %v461_v47 = vpop.xlane.xlu1 %460 }
 0x3af   : > { %1489 = vrcp.f32 %v461_v47 }
 0x3b5   : > { %v1488_v48 = vpop.eup %1487 }
 0x3b6   : > { %v450_v49 = vmul.f32 %v1488_v48, %v1486_v40 }
 0x3b8   : > { %v451_v52 = vmul.f32 0.7, %v450_v49 }
 0x3b9   : > { %v1490_v50 = vpop.eup %1489 }
 0x3ba   : > { %v463_v51 = vmul.f32 %v1490_v50, %v1484_v39 }
 0x3bc   : > { %v464_v53 = vmul.f32 0.3, %v463_v51 }
 0x3be   : > { %v465_v56 = vadd.f32 %v464_v53, %v451_v52 }
 0x3c0   : > { %v466_v58 = vpack.c.bf16 %v465_v56, %v465_v56 }
 0x3c2   : > { %1350 = vmatmul.mubr.msk.bf16.vlgmr.msra.gmra.mrb[0].mxu1 %vm439_vm4, %v466_v58 }
 0x3c3   : > { %1354 = vmatpush3.bf16.msra.mxu1 %v517_v57  ;;  %1355 = vmatprep.mubr.msk.bf16.mxu1 %vm1634_vm2, %v1633_v22 }
 0x495   : > { %v509_v59 = vpop.f32.mrb[0].mxu1 }
 0x496   : > { %v519_v60 = vpack.c.bf16 %v509_v59, %v509_v59  ;;  %v1351_v61 = vpop.f32.mrb[1].mxu1 }
 0x497   : > { %v512_v62 = vpop.f32.mrb[2].mxu1 }
 0x498   : > { %v1352_v63 = vpop.f32.mrb[3].mxu1  ;;  %1356 = vmatmul.mubr.msk.bf16.vlgmr.msra.gmra.mrb[4].mxu1 %vm391_vm3, %v519_v60 }
 0x56b   : > { %v557_v1 = vpop.f32.mrb[4].mxu1 }
 0x56c   : > { %v563_v2 = vadd.f32 %v557_v1, %v518_v0  ;;  %v1357_v3 = vpop.f32.mrb[5].mxu1 }
 0x56d   : > { %v560_v4 = vpop.f32.mrb[6].mxu1 }
 0x56e   : > { %564 = vst.msk [vmem:[#allocation3] sm:$0xff] %vm331_vm0, %v563_v2  ;;  %v1358_v5 = vpop.f32.mrb[7].mxu1 }
 0x56f PF: > { %s1291_s29 = sld [smem:[#allocation5 + $0x1]] }
 0x575   : > { %p1292_p0 = scmp.le.s32.totalorder %s1291_s29, 0 }
 0x576   : > { %v570_v6 = vld [vmem:[#allocation2] sm:$0xff] (!%p1292_p0)  ;;  %v1636_v8 = vmov (!%p1292_p0), 0.0   ;;  %vm1637_vm6 = vmmov (!%p1292_p0), 0   ;;  %s1638_s30 = smov (!%p1292_p0), 48   ;;  %s1639_s14 = smov (!%p1292_p0), 112   ;;  %vm578_vm7 = vcmask (!%p1292_p0), 130048  }
 0x577   : > { %569 = sbr.rel (%p1292_p0) target bundleno = 2491 (0x9bb), region = 60  ;;  %v572_v7 = vpack.c.bf16 (!%p1292_p0), %v570_v6, %v570_v6  ;;  %1359 = vmatprep.subr.bf16.mxu0 (!%p1292_p0), %v1636_v8  ;;  %1361 = vmatprep.mubr.msk.bf16.mxu0 (!%p1292_p0), %vm1637_vm6, %v1636_v8  ;;  %vm626_vm8 = vcmask (!%p1292_p0), 64512   ;;  %v1294_v17 = vld [vmem:[%s1793_s9 + $0x8] sm:$0xff] (!%p1292_p0)  ;;  %vm662_vm9 = vcmask (!%p1292_p0), 1043456   ;;  %v706_v43 = vld [vmem:[%s1974_s4 + $0x10] sm:$0xff] (!%p1292_p0)  ;;  %v707_v44 = vld [vmem:[%s1974_s4 + $0x18] sm:$0xff] (!%p1292_p0) }
 0x578   : > { %1365 = vmatprep.subr.bf16.mxu1 (!%p1292_p0), %v1636_v8  ;;  %1367 = vmatprep.mubr.msk.bf16.mxu1 (!%p1292_p0), %vm1637_vm6, %v1636_v8  ;;  %v641_v20 = vsel (!%p1292_p0), %vm626_vm8, %v1294_v17, -inf  ;;  %v571_v31 = vld [vmem:[#allocation2 + $0x8] sm:$0xff] (!%p1292_p0)  ;;  %v708_v46 = vpack.c.bf16 (!%p1292_p0), %v707_v44, %v706_v43  ;;  %v709_v53 = vld [vmem:[#allocation3] sm:$0xff] (!%p1292_p0) }
 0x579   : > { %576 = vrot.lane.b32.xlu0 (!%p1292_p0), %v572_v7, %s1638_s30  ;;  %v655_v32 = vpack.c.bf16 (!%p1292_p0), %v571_v31, %v571_v31 }
 0x57d   : > { %574 = vrot.lane.b32.xlu0 (!%p1292_p0), %v572_v7, %s1639_s14 }
 0x5eb   : > { %v577_v9 = vpop.permute.xlu0 %576 }
 0x5ec   : > { %v583_v10 = vsel %vm578_vm7, %v577_v9, 0 }
 0x5ed   : > { %1360 = vmatpush3.bf16.xpose.msra.mxu0 %v583_v10 }
 0x5ef   : > { %v575_v11 = vpop.permute.xlu0 %574 }
 0x5f4   : > { %1362 = vmatmul.mubr.msk.bf16.vlgmr.msra.gmra.mrb[0].mxu0 %vm578_vm7, %v575_v11 }
 0x6c7   : > { %v619_v12 = vpop.f32.mrb[0].mxu0 }
 0x6c8   : > { %v625_v13 = vmul.f32 0.25, %v619_v12  ;;  %v1363_v15 = vpop.f32.mrb[1].mxu0 }
 0x6c9   : > { %v622_v16 = vpop.f32.mrb[2].mxu0 }
 0x6ca   : > { %v1364_v18 = vpop.f32.mrb[3].mxu0  ;;  %v627_v19 = vsel %vm626_vm8, %v625_v13, -inf }
 0x6cb   : > { %628 = vmax.xlane.f32.xlu1 %v627_v19 }
 0x6cf   : > { %642 = vmax.xlane.f32.xlu1 %v641_v20 }
 0x758   : > { %v629_v21 = vpop.xlane.xlu1 %628 }
 0x759   : > { %v630_v22 = vsub.f32 %v625_v13, %v629_v21 }
 0x75b   : > { %v631_v23 = vmul.f32 1.442695, %v630_v22 }
 0x75c   : > { %v643_v24 = vpop.xlane.xlu1 %642 }
 0x75d   : > { %1491 = vpow2.f32 %v631_v23  ;;  %v644_v25 = vsub.f32 %v1294_v17, %v643_v24 }
 0x75f   : > { %v645_v26 = vmul.f32 1.442695, %v644_v25 }
 0x761   : > { %1493 = vpow2.f32 %v645_v26 }
 0x767   : > { %v1492_v27 = vpop.eup %1491 }
 0x768   : > { %v633_v28 = vsel %vm626_vm8, %v1492_v27, 0.0 }
 0x769   : > { %634 = vadd.xlane.f32.xlu0 %v633_v28 }
 0x76b   : > { %v1494_v29 = vpop.eup %1493 }
 0x76c   : > { %v647_v30 = vsel %vm626_vm8, %v1494_v29, 0.0 }
 0x76d   : > { %648 = vadd.xlane.f32.xlu1 %v647_v30 }
 0x77e   : > { %657 = vrot.lane.b32.xlu1 %v655_v32, %s1639_s14 }
 0x7f6   : > { %v635_v33 = vpop.xlane.xlu0 %634 }
 0x7f7   : > { %1495 = vrcp.f32 %v635_v33 }
 0x7fa   : > { %v649_v34 = vpop.xlane.xlu1 %648 }
 0x7fb   : > { %1497 = vrcp.f32 %v649_v34 }
 0x7fe   : > { %v658_v35 = vpop.permute.xlu1 %657 }
 0x7ff   : > { %v664_v36 = vsel %vm662_vm9, %v658_v35, 0 }
 0x800   : > { %1366 = vmatpush3.bf16.msra.mxu1 %v664_v36 }
 0x801   : > { %v1496_v37 = vpop.eup %1495  ;;  %1371 = vmatprep.subr.bf16.mxu1 %v1636_v8 }
 0x802   : > { %v637_v38 = vmul.f32 %v1496_v37, %v1492_v27 }
 0x804   : > { %v638_v41 = vmul.f32 0.7, %v637_v38 }
 0x805   : > { %v1498_v39 = vpop.eup %1497 }
 0x806   : > { %v651_v40 = vmul.f32 %v1498_v39, %v1494_v29 }
 0x808   : > { %v652_v42 = vmul.f32 0.3, %v651_v40 }
 0x80a   : > { %v653_v45 = vadd.f32 %v652_v42, %v638_v41 }
 0x80c   : > { %v654_v47 = vpack.c.bf16 %v653_v45, %v653_v45 }
 0x80e   : > { %1368 = vmatmul.mubr.msk.bf16.vlgmr.msra.gmra.mrb[0].mxu1 %vm626_vm8, %v654_v47 }
 0x80f   : > { %1372 = vmatpush3.bf16.msra.mxu1 %v708_v46  ;;  %1373 = vmatprep.mubr.msk.bf16.mxu1 %vm1637_vm6, %v1636_v8 }
 0x8e1   : > { %v700_v48 = vpop.f32.mrb[0].mxu1 }
 0x8e2   : > { %v710_v49 = vpack.c.bf16 %v700_v48, %v700_v48  ;;  %v1369_v50 = vpop.f32.mrb[1].mxu1 }
 0x8e3   : > { %v703_v51 = vpop.f32.mrb[2].mxu1 }
 0x8e4   : > { %v1370_v52 = vpop.f32.mrb[3].mxu1  ;;  %1374 = vmatmul.mubr.msk.bf16.vlgmr.msra.gmra.mrb[4].mxu1 %vm578_vm7, %v710_v49 }
 0x9b7   : > { %v748_v54 = vpop.f32.mrb[4].mxu1 }
 0x9b8   : > { %v754_v55 = vadd.f32 %v748_v54, %v709_v53  ;;  %v1375_v56 = vpop.f32.mrb[5].mxu1 }
 0x9b9   : > { %v751_v57 = vpop.f32.mrb[6].mxu1 }
 0x9ba   : > { %755 = vst.msk [vmem:[#allocation3] sm:$0xff] %vm331_vm0, %v754_v55  ;;  %v1376_v58 = vpop.f32.mrb[7].mxu1 }
 0x9bb PF: > { %s1297_s21 = sld [smem:[#allocation5 + $0x2]] }
 0x9c1   : > { %p1298_p1 = scmp.le.s32.totalorder %s1297_s21, 0 }
 0x9c2   : > { %v761_v59 = vld [vmem:[#allocation2] sm:$0xff] (!%p1298_p1)  ;;  %v1640_v61 = vmov (!%p1298_p1), 0.0   ;;  %vm1641_vm10 = vmmov (!%p1298_p1), 0   ;;  %s1642_s23 = smov (!%p1298_p1), 32   ;;  %s1643_s28 = smov (!%p1298_p1), 96   ;;  %vm769_vm11 = vcmask (!%p1298_p1), 130048  }
 0x9c3   : > { %760 = sbr.rel (%p1298_p1) target bundleno = 3591 (0xe07), region = 64  ;;  %v763_v60 = vpack.c.bf16 (!%p1298_p1), %v761_v59, %v761_v59  ;;  %1377 = vmatprep.subr.bf16.mxu0 (!%p1298_p1), %v1640_v61  ;;  %1379 = vmatprep.mubr.msk.bf16.mxu0 (!%p1298_p1), %vm1641_vm10, %v1640_v61  ;;  %vm817_vm12 = vcmask (!%p1298_p1), 64512   ;;  %v1300_v5 = vld [vmem:[%s1793_s9 + $0x10] sm:$0xff] (!%p1298_p1)  ;;  %v762_v20 = vld [vmem:[#allocation2 + $0x8] sm:$0xff] (!%p1298_p1)  ;;  %vm853_vm13 = vcmask (!%p1298_p1), 1043456   ;;  %v897_v32 = vld [vmem:[%s1974_s4 + $0x20] sm:$0xff] (!%p1298_p1) }
 0x9c4   : > { %1383 = vmatprep.subr.bf16.mxu1 (!%p1298_p1), %v1640_v61  ;;  %1385 = vmatprep.mubr.msk.bf16.mxu1 (!%p1298_p1), %vm1641_vm10, %v1640_v61  ;;  %v832_v8 = vsel (!%p1298_p1), %vm817_vm12, %v1300_v5, -inf  ;;  %v846_v21 = vpack.c.bf16 (!%p1298_p1), %v762_v20, %v762_v20  ;;  %v898_v33 = vld [vmem:[%s1974_s4 + $0x28] sm:$0xff] (!%p1298_p1)  ;;  %v900_v42 = vld [vmem:[#allocation3] sm:$0xff] (!%p1298_p1) }
 0x9c5   : > { %767 = vrot.lane.b32.xlu0 (!%p1298_p1), %v763_v60, %s1642_s23  ;;  %v899_v35 = vpack.c.bf16 (!%p1298_p1), %v898_v33, %v897_v32 }
 0x9c9   : > { %765 = vrot.lane.b32.xlu0 (!%p1298_p1), %v763_v60, %s1643_s28 }
 0xa37   : > { %v768_v62 = vpop.permute.xlu0 %767 }
 0xa38   : > { %v774_v63 = vsel %vm769_vm11, %v768_v62, 0 }
 0xa39   : > { %1378 = vmatpush3.bf16.xpose.msra.mxu0 %v774_v63 }
 0xa3b   : > { %v766_v0 = vpop.permute.xlu0 %765 }
 0xa40   : > { %1380 = vmatmul.mubr.msk.bf16.vlgmr.msra.gmra.mrb[0].mxu0 %vm769_vm11, %v766_v0 }
 0xb13   : > { %v810_v1 = vpop.f32.mrb[0].mxu0 }
 0xb14   : > { %v816_v2 = vmul.f32 0.25, %v810_v1  ;;  %v1381_v3 = vpop.f32.mrb[1].mxu0 }
 0xb15   : > { %v813_v4 = vpop.f32.mrb[2].mxu0 }
 0xb16   : > { %v1382_v6 = vpop.f32.mrb[3].mxu0  ;;  %v818_v7 = vsel %vm817_vm12, %v816_v2, -inf }
 0xb17   : > { %819 = vmax.xlane.f32.xlu1 %v818_v7 }
 0xb1b   : > { %833 = vmax.xlane.f32.xlu1 %v832_v8 }
 0xba4   : > { %v820_v9 = vpop.xlane.xlu1 %819 }
 0xba5   : > { %v821_v10 = vsub.f32 %v816_v2, %v820_v9 }
 0xba7   : > { %v822_v11 = vmul.f32 1.442695, %v821_v10 }
 0xba8   : > { %v834_v12 = vpop.xlane.xlu1 %833 }
 0xba9   : > { %1499 = vpow2.f32 %v822_v11  ;;  %v835_v13 = vsub.f32 %v1300_v5, %v834_v12 }
 0xbab   : > { %v836_v15 = vmul.f32 1.442695, %v835_v13 }
 0xbad   : > { %1501 = vpow2.f32 %v836_v15 }
 0xbb3   : > { %v1500_v16 = vpop.eup %1499 }
 0xbb4   : > { %v824_v17 = vsel %vm817_vm12, %v1500_v16, 0.0 }
 0xbb5   : > { %825 = vadd.xlane.f32.xlu0 %v824_v17 }
 0xbb7   : > { %v1502_v18 = vpop.eup %1501 }
 0xbb8   : > { %v838_v19 = vsel %vm817_vm12, %v1502_v18, 0.0 }
 0xbb9   : > { %839 = vadd.xlane.f32.xlu1 %v838_v19 }
 0xbca   : > { %848 = vrot.lane.b32.xlu1 %v846_v21, %s1643_s28 }
 0xc42   : > { %v826_v22 = vpop.xlane.xlu0 %825 }
 0xc43   : > { %1503 = vrcp.f32 %v826_v22 }
 0xc46   : > { %v840_v23 = vpop.xlane.xlu1 %839 }
 0xc47   : > { %1505 = vrcp.f32 %v840_v23 }
 0xc4a   : > { %v849_v24 = vpop.permute.xlu1 %848 }
 0xc4b   : > { %v855_v25 = vsel %vm853_vm13, %v849_v24, 0 }
 0xc4c   : > { %1384 = vmatpush3.bf16.msra.mxu1 %v855_v25 }
 0xc4d   : > { %v1504_v26 = vpop.eup %1503  ;;  %1389 = vmatprep.subr.bf16.mxu1 %v1640_v61 }
 0xc4e   : > { %v828_v27 = vmul.f32 %v1504_v26, %v1500_v16 }
 0xc50   : > { %v829_v30 = vmul.f32 0.7, %v828_v27 }
 0xc51   : > { %v1506_v28 = vpop.eup %1505 }
 0xc52   : > { %v842_v29 = vmul.f32 %v1506_v28, %v1502_v18 }
 0xc54   : > { %v843_v31 = vmul.f32 0.3, %v842_v29 }
 0xc56   : > { %v844_v34 = vadd.f32 %v843_v31, %v829_v30 }
 0xc58   : > { %v845_v36 = vpack.c.bf16 %v844_v34, %v844_v34 }
 0xc5a   : > { %1386 = vmatmul.mubr.msk.bf16.vlgmr.msra.gmra.mrb[0].mxu1 %vm817_vm12, %v845_v36 }
 0xc5b   : > { %1390 = vmatpush3.bf16.msra.mxu1 %v899_v35  ;;  %1391 = vmatprep.mubr.msk.bf16.mxu1 %vm1641_vm10, %v1640_v61 }
 0xd2d   : > { %v891_v37 = vpop.f32.mrb[0].mxu1 }
 0xd2e   : > { %v901_v38 = vpack.c.bf16 %v891_v37, %v891_v37  ;;  %v1387_v39 = vpop.f32.mrb[1].mxu1 }
 0xd2f   : > { %v894_v40 = vpop.f32.mrb[2].mxu1 }
 0xd30   : > { %v1388_v41 = vpop.f32.mrb[3].mxu1  ;;  %1392 = vmatmul.mubr.msk.bf16.vlgmr.msra.gmra.mrb[4].mxu1 %vm769_vm11, %v901_v38 }
 0xe03   : > { %v939_v43 = vpop.f32.mrb[4].mxu1 }
 0xe04   : > { %v945_v44 = vadd.f32 %v939_v43, %v900_v42  ;;  %v1393_v45 = vpop.f32.mrb[5].mxu1 }
 0xe05   : > { %v942_v46 = vpop.f32.mrb[6].mxu1 }
 0xe06   : > { %946 = vst.msk [vmem:[#allocation3] sm:$0xff] %vm331_vm0, %v945_v44  ;;  %v1394_v47 = vpop.f32.mrb[7].mxu1 }
 0xe07 PF: > { %s1303_s17 = sld [smem:[#allocation5 + $0x3]] }
 0xe0d   : > { %p1304_p3 = scmp.le.s32.totalorder %s1303_s17, 0 }
 0xe0e   : > { %v952_v48 = vld [vmem:[#allocation2] sm:$0xff] (!%p1304_p3)  ;;  %v1644_v50 = vmov (!%p1304_p3), 0.0   ;;  %vm1645_vm14 = vmmov (!%p1304_p3), 0   ;;  %s1646_s25 = smov (!%p1304_p3), 16   ;;  %s1647_s24 = smov (!%p1304_p3), 80   ;;  %vm960_vm15 = vcmask (!%p1304_p3), 130048  }
 0xe0f   : > { %951 = sbr.rel (%p1304_p3) target bundleno = 4691 (0x1253), region = 68  ;;  %v954_v49 = vpack.c.bf16 (!%p1304_p3), %v952_v48, %v952_v48  ;;  %1395 = vmatprep.subr.bf16.mxu0 (!%p1304_p3), %v1644_v50  ;;  %1397 = vmatprep.mubr.msk.bf16.mxu0 (!%p1304_p3), %vm1645_vm14, %v1644_v50  ;;  %vm1008_vm1 = vcmask (!%p1304_p3), 64512   ;;  %v1306_v58 = vld [vmem:[%s1793_s9 + $0x18] sm:$0xff] (!%p1304_p3)  ;;  %v953_v8 = vld [vmem:[#allocation2 + $0x8] sm:$0xff] (!%p1304_p3)  ;;  %vm1044_vm2 = vcmask (!%p1304_p3), 1043456   ;;  %v1088_v21 = vld [vmem:[%s1974_s4 + $0x30] sm:$0xff] (!%p1304_p3) }
 0xe10   : > { %1401 = vmatprep.subr.bf16.mxu1 (!%p1304_p3), %v1644_v50  ;;  %1403 = vmatprep.mubr.msk.bf16.mxu1 (!%p1304_p3), %vm1645_vm14, %v1644_v50  ;;  %v1023_v61 = vsel (!%p1304_p3), %vm1008_vm1, %v1306_v58, -inf  ;;  %v1037_v9 = vpack.c.bf16 (!%p1304_p3), %v953_v8, %v953_v8  ;;  %v1089_v22 = vld [vmem:[%s1974_s4 + $0x38] sm:$0xff] (!%p1304_p3)  ;;  %v1091_v31 = vld [vmem:[#allocation3] sm:$0xff] (!%p1304_p3) }
 0xe11   : > { %958 = vrot.lane.b32.xlu0 (!%p1304_p3), %v954_v49, %s1646_s25  ;;  %v1090_v24 = vpack.c.bf16 (!%p1304_p3), %v1089_v22, %v1088_v21 }
 0xe15   : > { %956 = vrot.lane.b32.xlu0 (!%p1304_p3), %v954_v49, %s1647_s24 }
 0xe83   : > { %v959_v51 = vpop.permute.xlu0 %958 }
 0xe84   : > { %v965_v52 = vsel %vm960_vm15, %v959_v51, 0 }
 0xe85   : > { %1396 = vmatpush3.bf16.xpose.msra.mxu0 %v965_v52 }
 0xe87   : > { %v957_v53 = vpop.permute.xlu0 %956 }
 0xe8c   : > { %1398 = vmatmul.mubr.msk.bf16.vlgmr.msra.gmra.mrb[0].mxu0 %vm960_vm15, %v957_v53 }
 0xf5f   : > { %v1001_v54 = vpop.f32.mrb[0].mxu0 }
 0xf60   : > { %v1007_v55 = vmul.f32 0.25, %v1001_v54  ;;  %v1399_v56 = vpop.f32.mrb[1].mxu0 }
 0xf61   : > { %v1004_v57 = vpop.f32.mrb[2].mxu0 }
 0xf62   : > { %v1400_v59 = vpop.f32.mrb[3].mxu0  ;;  %v1009_v60 = vsel %vm1008_vm1, %v1007_v55, -inf }
 0xf63   : > { %1010 = vmax.xlane.f32.xlu1 %v1009_v60 }
 0xf67   : > { %1024 = vmax.xlane.f32.xlu1 %v1023_v61 }
 0xff0   : > { %v1011_v62 = vpop.xlane.xlu1 %1010 }
 0xff1   : > { %v1012_v63 = vsub.f32 %v1007_v55, %v1011_v62 }
 0xff3   : > { %v1013_v0 = vmul.f32 1.442695, %v1012_v63 }
 0xff4   : > { %v1025_v1 = vpop.xlane.xlu1 %1024 }
 0xff5   : > { %1507 = vpow2.f32 %v1013_v0  ;;  %v1026_v2 = vsub.f32 %v1306_v58, %v1025_v1 }
 0xff7   : > { %v1027_v3 = vmul.f32 1.442695, %v1026_v2 }
 0xff9   : > { %1509 = vpow2.f32 %v1027_v3 }
 0xfff   : > { %v1508_v4 = vpop.eup %1507 }
0x1000   : > { %v1015_v5 = vsel %vm1008_vm1, %v1508_v4, 0.0 }
0x1001   : > { %1016 = vadd.xlane.f32.xlu0 %v1015_v5 }
0x1003   : > { %v1510_v6 = vpop.eup %1509 }
0x1004   : > { %v1029_v7 = vsel %vm1008_vm1, %v1510_v6, 0.0 }
0x1005   : > { %1030 = vadd.xlane.f32.xlu1 %v1029_v7 }
0x1016   : > { %1039 = vrot.lane.b32.xlu1 %v1037_v9, %s1647_s24 }
0x108e   : > { %v1017_v10 = vpop.xlane.xlu0 %1016 }
0x108f   : > { %1511 = vrcp.f32 %v1017_v10 }
0x1092   : > { %v1031_v11 = vpop.xlane.xlu1 %1030 }
0x1093   : > { %1513 = vrcp.f32 %v1031_v11 }
0x1096   : > { %v1040_v12 = vpop.permute.xlu1 %1039 }
0x1097   : > { %v1046_v13 = vsel %vm1044_vm2, %v1040_v12, 0 }
0x1098   : > { %1402 = vmatpush3.bf16.msra.mxu1 %v1046_v13 }
0x1099   : > { %v1512_v15 = vpop.eup %1511  ;;  %1407 = vmatprep.subr.bf16.mxu1 %v1644_v50 }
0x109a   : > { %v1019_v16 = vmul.f32 %v1512_v15, %v1508_v4 }
0x109c   : > { %v1020_v19 = vmul.f32 0.7, %v1019_v16 }
0x109d   : > { %v1514_v17 = vpop.eup %1513 }
0x109e   : > { %v1033_v18 = vmul.f32 %v1514_v17, %v1510_v6 }
0x10a0   : > { %v1034_v20 = vmul.f32 0.3, %v1033_v18 }
0x10a2   : > { %v1035_v23 = vadd.f32 %v1034_v20, %v1020_v19 }
0x10a4   : > { %v1036_v25 = vpack.c.bf16 %v1035_v23, %v1035_v23 }
0x10a6   : > { %1404 = vmatmul.mubr.msk.bf16.vlgmr.msra.gmra.mrb[0].mxu1 %vm1008_vm1, %v1036_v25 }
0x10a7   : > { %1408 = vmatpush3.bf16.msra.mxu1 %v1090_v24  ;;  %1409 = vmatprep.mubr.msk.bf16.mxu1 %vm1645_vm14, %v1644_v50 }
0x1179   : > { %v1082_v26 = vpop.f32.mrb[0].mxu1 }
0x117a   : > { %v1092_v27 = vpack.c.bf16 %v1082_v26, %v1082_v26  ;;  %v1405_v28 = vpop.f32.mrb[1].mxu1 }
0x117b   : > { %v1085_v29 = vpop.f32.mrb[2].mxu1 }
0x117c   : > { %v1406_v30 = vpop.f32.mrb[3].mxu1  ;;  %1410 = vmatmul.mubr.msk.bf16.vlgmr.msra.gmra.mrb[4].mxu1 %vm960_vm15, %v1092_v27 }
0x124f   : > { %v1130_v32 = vpop.f32.mrb[4].mxu1 }
0x1250   : > { %v1136_v33 = vadd.f32 %v1130_v32, %v1091_v31  ;;  %v1411_v34 = vpop.f32.mrb[5].mxu1 }
0x1251   : > { %v1133_v35 = vpop.f32.mrb[6].mxu1 }
0x1252   : > { %1137 = vst.msk [vmem:[#allocation3] sm:$0xff] %vm331_vm0, %v1136_v33  ;;  %v1412_v36 = vpop.f32.mrb[7].mxu1 }
0x1253 PF: > { %v1309_v38 = vld [vmem:[%s1975_s5] ss:$0 sm:$0xff]  ;;  %s1313_s24 = sshll.u32 %s1718_s13, 7  ;;  %s1193_s9 = sshll.u32 %s306_s22, 4  ;;  %s1925_s9 = int_to_ptr.vmem [resolvable:$true] %s1193_s9 }
0x1254   : > { %v1310_v50 = vld [vmem:[%s1976_s6] ss:$0 sm:$0xff]  ;;  %s1923_s28 = scalar_lea.hbm %s1978_s8, %s1313_s24  ;;  %s1180_s29 = scalar_lea.sflag [#allocation8], %s304_s26 }
0x1255   : > { %v1311_v52 = vld [vmem:[%s1977_s7] ss:$0 sm:$0xff]  ;;  %s1557_s13 = scalar_lea.vmem %s1925_s9, 128  ;;  %p1989_p8 = scmp.ne.s32.totalorder %s1982_s19, 0 }
0x1256   : > { %p1558_p7 = scmp.ne.s32.totalorder %s1925_s9, %s1557_s13  ;;  %s1648_s30 = smov [#allocation9]  }
0x1257   : > { %s1561_s14 = sshll.u32 %s1648_s30, 4  ;;  %s1562_s14 = int_to_ptr.vmem [resolvable:$false] %s1561_s14 }
0x1258   : > { %p1559_p9 = pnand %p1558_p7, %p1989_p8  ;;  %s1563_s16 = scalar_lea.vmem %s1562_s14, 256 }
0x1259   : > { %v1138_v37 = vld [vmem:[#allocation3] sm:$0xff]  ;;  %p1564_p13 = scmp.lt.s32.totalorder %s1925_s9, %s1562_s14  ;;  %p1565_p2 = scmp.lt.s32.totalorder %s1563_s16, %s1557_s13 }
0x125a   : > { %v1146_v39 = vadd.f32 %v1309_v38, %v1138_v37  ;;  %p1560_p12 = pneg %p1559_p9 }
0x125b   : > { %p1566_p4 = por %p1565_p2, %p1564_p13 }
0x125c   : > { %v1147_v40 = vadd.f32 %v1146_v39, %v1798_v14 }
0x125d   : > { %p1567_p6 = pnand %p1566_p4, %p1560_p12 }
0x125e   : > { %v1148_v41 = vsel %vm331_vm0, %v1147_v40, 0.0 }
0x125f   : > { %1149 = vadd.xlane.f32.xlu0 %v1148_v41 }
0x12ec   : > { %v1150_v42 = vpop.xlane.xlu0 %1149 }
0x12ed   : > { %v1152_v43 = vmul.f32 0.03125, %v1150_v42 }
0x12ef   : > { %v1153_v44 = vsub.f32 %v1147_v40, %v1152_v43 }
0x12f1   : > { %v1154_v45 = vmul.f32 %v1153_v44, %v1153_v44 }
0x12f3   : > { %v1155_v46 = vsel %vm331_vm0, %v1154_v45, 0.0 }
0x12f4   : > { %1156 = vadd.xlane.f32.xlu0 %v1155_v46 }
0x1381   : > { %v1157_v47 = vpop.xlane.xlu0 %1156 }
0x1382   : > { %v1158_v48 = vmul.f32 0.03125, %v1157_v47 }
0x1384   : > { %v1159_v49 = vadd.f32 1e-05, %v1158_v48 }
0x1386   : > { %1515 = vrsqrt.f32 %v1159_v49 }
0x1390   : > { %v1516_v14 = vpop.eup %1515 }
0x1391   : > { %v1161_v51 = vmul.f32 %v1516_v14, %v1153_v44 }
0x1393   : > { %v1169_v53 = vmul.f32 %v1310_v50, %v1161_v51 }
0x1395   : > { %v1177_v54 = vadd.f32 %v1311_v52, %v1169_v53 }
0x1397   : > { %1178 = vst.msk [vmem:[%s306_s22] sm:$0xff] %vm331_vm0, %v1177_v54 }
0x1398   : > { %1570 = shalt.err (!%p1567_p6)
}
0x1399   : > { %s1571_s26 = scalar_lea.hbm %s1923_s28, 128  ;;  %s1575_s17 = scalar_lea.hbm %s1978_s8, 256 }
0x139a   : > { %p1572_p5 = scmp.ne.s32.totalorder %s1923_s28, %s1571_s26  ;;  %p1576_p0 = scmp.lt.u32.totalorder %s1923_s28, %s1978_s8 }
0x139b   : > { %p1577_p1 = scmp.lt.u32.totalorder %s1575_s17, %s1571_s26  ;;  %p1579_p7 = scmp.lt.u32.totalorder %s1571_s26, %s1923_s28 }
0x139c   : > { %p1573_p10 = pnand %p1572_p5, %p1989_p8 }
0x139d   : > { %p1578_p3 = por %p1577_p1, %p1576_p0 }
0x139e   : > { %p1574_p11 = pneg %p1573_p10 }
0x139f   : > { %p1580_p9 = por %p1579_p7, %p1578_p3 }
0x13a1   : > { %p1581_p12 = pnand %p1580_p9, %p1574_p11 }
0x13a3   : > { %1584 = shalt.err (!%p1581_p12)
}
0x13a4   : > { %1417 = dma.vmem_to_hbm [thread:$0]  (%p1989_p8), %s1925_s9, 128, %s1923_s28, %s1180_s29  }
0x13a5 PF: > { %p1429_p13 = scmp.ge.s32.totalorder %s1625_s12, 2  ;;  %s1205_s21 = sand.u32 1, %s1613_s10  }
0x13a6   : > { %p1990_p2 = scmp.ne.s32.totalorder %s1983_s20, 0  ;;  %s1206_s23 = scalar_lea.sflag [#allocation8], %s1205_s21 }
0x13a8   : > { %p1424_p4 = pnand %p1429_p13, %p1990_p2 }
0x13aa   : > { %1608 = dma.done.wait (!%p1424_p4), %s1206_s23, 128  }
0x13ab   : > { %1610 = vsyncadd (!%p1424_p4), %s1206_s23, 4294967168  ;;  %p25_p6 = scmp.ge.s32.totalorder %s1722_s15, 4   ;;  %s1991_s10 = smov %s1617_s11 }
0x13ac   : > { %s1992_s11 = smov %s1621_s0  ;;  %s1993_s0 = smov %s1733_s18 }
0x13ad   : > { %s1994_s12 = smov %s1722_s15  ;;  %27 = sbr.rel (!%p25_p6) target bundleno = 19 (0x13), region = 110 }
0x13b4   :  { %1211 = vsyncpa [#allocation7], 1 }
0x13b5   :  { %1213 = vsyncpa [#allocation7 + $0x1], 1 }
0x13b6   :  { %1214 = vsyncpa [#allocation8], 1 }
0x13b7   :  { %1216 = vsyncpa [#allocation8 + $0x1], 1 }

</bundles_post_ra>
